<compile_context>
chip_gen: v7x
topology: tpu7x:2x2x1
jax: 0.10.0
libtpu: 0.0.40
codegen_flags: <defaults>
</compile_context>

<pallas_src>
import functools
import math

import jax
import jax.numpy as jnp
from jax.experimental import pallas as pl
from jax.experimental.pallas import tpu as pltpu


# ----------------------------------------------------------------------------
# In-kernel helpers
# ----------------------------------------------------------------------------
def _ln(x, g, b, eps):
    """Row-wise LayerNorm in fp32. x: (S, H); g, b: (1, H)."""
    mu = jnp.mean(x, axis=-1, keepdims=True)
    var = jnp.mean(jnp.square(x - mu), axis=-1, keepdims=True)
    return (x - mu) * jax.lax.rsqrt(var + eps) * g + b


# ----------------------------------------------------------------------------
# Fused BERT-encoder kernel: one batch row per grid step.
# ----------------------------------------------------------------------------
def _bert_cls_kernel(we_ref, pe_ref, te_ref, mask_ref,
                     embg_ref, embb_ref,
                     wqkv_ref, bqkv_ref, woh_ref, bo_ref,
                     ln1g_ref, ln1b_ref,
                     wi_ref, bi_ref, wo2_ref, bo2_ref,
                     ln2g_ref, ln2b_ref,
                     o_ref, *, num_layers, num_heads, head_dim, eps):
    """Weights are stacked with a leading layer axis L:

    wqkv_ref : (L, 3*nh, H, hd) bf16  -- [q heads..., k heads..., v heads...]
    bqkv_ref : (L, 3*nh, 1, hd) fp32
    woh_ref  : (L, nh, hd, H)   bf16  -- attn output projection, per-head rows
    wi_ref   : (L, H, I) bf16 ;  wo2_ref : (L, I, H) bf16
    """
    # --- embeddings: word + position + type, then LayerNorm (fused) ---------
    x = we_ref[0] + pe_ref[...] + te_ref[0]                  # (S, H) fp32
    x = _ln(x, embg_ref[...], embb_ref[...], eps)

    mask = mask_ref[0]                                        # (1, S) additive
    scale = 1.0 / math.sqrt(head_dim)

    for l in range(num_layers):
        xb = x.astype(jnp.bfloat16)

        # --- multi-head self-attention + output projection ------------------
        attn = None
        for h in range(num_heads):
            qh = (jnp.dot(xb, wqkv_ref[l, h],
                          preferred_element_type=jnp.float32)
                  + bqkv_ref[l, h])
            kh = (jnp.dot(xb, wqkv_ref[l, num_heads + h],
                          preferred_element_type=jnp.float32)
                  + bqkv_ref[l, num_heads + h])
            vh = (jnp.dot(xb, wqkv_ref[l, 2 * num_heads + h],
                          preferred_element_type=jnp.float32)
                  + bqkv_ref[l, 2 * num_heads + h])

            # scores / softmax stay in fp32 (mask add must not saturate)
            s = jnp.einsum("qd,kd->qk",
                           qh.astype(jnp.bfloat16), kh.astype(jnp.bfloat16),
                           preferred_element_type=jnp.float32) * scale
            s = s + mask                                      # (S,S) + (1,S)
            s = s - jnp.max(s, axis=-1, keepdims=True)
            p = jnp.exp(s)
            p = p * pl.reciprocal(jnp.sum(p, axis=-1, keepdims=True),
                                  approx=True)

            ctx = jnp.dot(p.astype(jnp.bfloat16), vh.astype(jnp.bfloat16),
                          preferred_element_type=jnp.float32)   # (S, hd)
            contrib = jnp.dot(ctx.astype(jnp.bfloat16), woh_ref[l, h],
                              preferred_element_type=jnp.float32)  # (S, H)
            attn = contrib if attn is None else attn + contrib

        attn = attn + bo_ref[l]

        # --- residual + LayerNorm 1 -----------------------------------------
        h1 = _ln(attn + x, ln1g_ref[l], ln1b_ref[l], eps)

        # --- FFN: dense -> GELU -> dense ------------------------------------
        inter = (jnp.dot(h1.astype(jnp.bfloat16), wi_ref[l],
                         preferred_element_type=jnp.float32) + bi_ref[l])
        # TODO(synk): HF BERT uses exact erf GELU; tanh approximation here.
        inter = jax.nn.gelu(inter, approximate=True)
        ffn = (jnp.dot(inter.astype(jnp.bfloat16), wo2_ref[l],
                       preferred_element_type=jnp.float32) + bo2_ref[l])

        # --- residual + LayerNorm 2 -----------------------------------------
        x = _ln(ffn + h1, ln2g_ref[l], ln2b_ref[l], eps)

    # Only the CLS row is needed (output_way == 'cls').
    o_ref[0] = x[0:1, :].astype(o_ref.dtype)                  # (1, H)


# ----------------------------------------------------------------------------
# Parameter construction (deterministic, synthetic "BERT" weights)
# ----------------------------------------------------------------------------
CFG = dict(vocab=64, hidden=64, heads=2, layers=2, intermediate=128,
           max_pos=16, type_vocab=2)


def init_params(key, cfg):
    H, I = cfg["hidden"], cfg["intermediate"]
    nh, L = cfg["heads"], cfg["layers"]
    hd = H // nh

    def nrm(k, shape, std=0.02):
        return std * jax.random.normal(k, shape, dtype=jnp.float32)

    def split_head_cols(w):
        # (H, H) -> (nh, H, hd); head h == columns [h*hd:(h+1)*hd]
        return w.reshape(H, nh, hd).transpose(1, 0, 2)

    keys = iter(jax.random.split(key, 3 + 6 * L))
    params = {
        "word_emb": nrm(next(keys), (cfg["vocab"], H)),
        "pos_emb": nrm(next(keys), (cfg["max_pos"], H)),
        "type_emb": nrm(next(keys), (cfg["type_vocab"], H)),
        "emb_ln_g": jnp.ones((1, H), jnp.float32),
        "emb_ln_b": jnp.zeros((1, H), jnp.float32),
    }

    wqkv, bqkv, woh, wi, wo2 = [], [], [], [], []
    for _ in range(L):
        wq = nrm(next(keys), (H, H))
        wk = nrm(next(keys), (H, H))
        wv = nrm(next(keys), (H, H))
        wo = nrm(next(keys), (H, H))
        wqkv.append(jnp.concatenate(
            [split_head_cols(wq), split_head_cols(wk), split_head_cols(wv)],
            axis=0))                                           # (3nh, H, hd)
        bqkv.append(jnp.zeros((3 * nh, 1, hd), jnp.float32))
        woh.append(wo.reshape(nh, hd, H))
        wi.append(nrm(next(keys), (H, I)))
        wo2.append(nrm(next(keys), (I, H)))

    params.update(
        wqkv=jnp.stack(wqkv).astype(jnp.bfloat16),             # (L, 3nh, H, hd)
        bqkv=jnp.stack(bqkv),                                  # (L, 3nh, 1, hd)
        wo_h=jnp.stack(woh).astype(jnp.bfloat16),              # (L, nh, hd, H)
        bo=jnp.zeros((L, 1, H), jnp.float32),
        ln1_g=jnp.ones((L, 1, H), jnp.float32),
        ln1_b=jnp.zeros((L, 1, H), jnp.float32),
        wi=jnp.stack(wi).astype(jnp.bfloat16),                 # (L, H, I)
        bi=jnp.zeros((L, 1, I), jnp.float32),
        wo2=jnp.stack(wo2).astype(jnp.bfloat16),               # (L, I, H)
        bo2=jnp.zeros((L, 1, H), jnp.float32),
        ln2_g=jnp.ones((L, 1, H), jnp.float32),
        ln2_b=jnp.zeros((L, 1, H), jnp.float32),
    )
    return params


# ----------------------------------------------------------------------------
# Forward pass: BertModel(...).last_hidden_state[:, 0]  (output_way == 'cls')
# ----------------------------------------------------------------------------
def neural_network_forward(params, input_ids, attention_mask, token_type_ids,
                           cfg=CFG):
    B, S = input_ids.shape
    H, I = cfg["hidden"], cfg["intermediate"]
    nh, L = cfg["heads"], cfg["layers"]
    hd = H // nh

    # Embedding-table gathers are glue in plain JAX; everything downstream is
    # one fused Pallas kernel.
    we = params["word_emb"][input_ids]                         # (B, S, H)
    te = params["type_emb"][token_type_ids]                    # (B, S, H)
    pe = params["pos_emb"][:S]                                 # (S, H)

    # Additive attention mask in fp32: (B, 1, S)
    mask_add = ((1.0 - attention_mask.astype(jnp.float32))
                * -10000.0).reshape(B, 1, S)

    def bcast(shape):
        n = len(shape)
        return pl.BlockSpec(shape, lambda b, _n=n: (0,) * _n)

    out = pl.pallas_call(
        functools.partial(_bert_cls_kernel, num_layers=L, num_heads=nh,
                          head_dim=hd, eps=1e-12),
        out_shape=jax.ShapeDtypeStruct((B, 1, H), jnp.float32),
        grid=(B,),
        in_specs=[
            pl.BlockSpec((1, S, H), lambda b: (b, 0, 0)),      # word emb rows
            pl.BlockSpec((S, H), lambda b: (0, 0)),            # pos emb
            pl.BlockSpec((1, S, H), lambda b: (b, 0, 0)),      # type emb rows
            pl.BlockSpec((1, 1, S), lambda b: (b, 0, 0)),      # additive mask
            bcast((1, H)), bcast((1, H)),                      # emb LN g/b
            bcast((L, 3 * nh, H, hd)),                         # wqkv (bf16)
            bcast((L, 3 * nh, 1, hd)),                         # bqkv
            bcast((L, nh, hd, H)),                             # wo per-head
            bcast((L, 1, H)),                                  # bo
            bcast((L, 1, H)), bcast((L, 1, H)),                # ln1 g/b
            bcast((L, H, I)), bcast((L, 1, I)),                # wi (bf16), bi
            bcast((L, I, H)), bcast((L, 1, H)),                # wo2 (bf16), bo2
            bcast((L, 1, H)), bcast((L, 1, H)),                # ln2 g/b
        ],
        out_specs=pl.BlockSpec((1, 1, H), lambda b: (b, 0, 0)),
        compiler_params=pltpu.CompilerParams(
            dimension_semantics=("parallel",)),
    )(we, pe, te, mask_add,
      params["emb_ln_g"], params["emb_ln_b"],
      params["wqkv"], params["bqkv"], params["wo_h"], params["bo"],
      params["ln1_g"], params["ln1_b"],
      params["wi"], params["bi"], params["wo2"], params["bo2"],
      params["ln2_g"], params["ln2_b"])

    return out.reshape(B, H)   # CLS token representation


# ----------------------------------------------------------------------------
if __name__ == "__main__":
    B, S = 2, 8
    key = jax.random.PRNGKey(0)
    k_param, k_ids = jax.random.split(key)

    params = init_params(k_param, CFG)

    input_ids = jax.random.randint(k_ids, (B, S), 0, CFG["vocab"],
                                   dtype=jnp.int32)
    attention_mask = jnp.ones((B, S), dtype=jnp.int32)
    # mask out the last two tokens of the second sequence (padding)
    attention_mask = attention_mask.at[1, -2:].set(0)
    token_type_ids = jnp.zeros((B, S), dtype=jnp.int32)

    fwd = jax.jit(functools.partial(neural_network_forward, cfg=CFG))
    out = fwd(params, input_ids, attention_mask, token_type_ids)
    out = jax.block_until_ready(out)
    assert out.shape == (B, CFG["hidden"]) and out.dtype == jnp.float32
    print("KERNEL_OK")
</pallas_src>

<mosaic_0001>
module attributes {stable_mosaic.version = 11 : i64} {
  func.func @_bert_cls_kernel(%arg0: i32, %arg1: memref<1x8x64xf32, #tpu.memory_space<vmem>>, %arg2: memref<8x64xf32, #tpu.memory_space<vmem>>, %arg3: memref<1x8x64xf32, #tpu.memory_space<vmem>>, %arg4: memref<1x1x8xf32, #tpu.memory_space<vmem>>, %arg5: memref<1x64xf32, #tpu.memory_space<vmem>>, %arg6: memref<1x64xf32, #tpu.memory_space<vmem>>, %arg7: memref<2x6x64x32xbf16, #tpu.memory_space<vmem>>, %arg8: memref<2x6x1x32xf32, #tpu.memory_space<vmem>>, %arg9: memref<2x2x32x64xbf16, #tpu.memory_space<vmem>>, %arg10: memref<2x1x64xf32, #tpu.memory_space<vmem>>, %arg11: memref<2x1x64xf32, #tpu.memory_space<vmem>>, %arg12: memref<2x1x64xf32, #tpu.memory_space<vmem>>, %arg13: memref<2x64x128xbf16, #tpu.memory_space<vmem>>, %arg14: memref<2x1x128xf32, #tpu.memory_space<vmem>>, %arg15: memref<2x128x64xbf16, #tpu.memory_space<vmem>>, %arg16: memref<2x1x64xf32, #tpu.memory_space<vmem>>, %arg17: memref<2x1x64xf32, #tpu.memory_space<vmem>>, %arg18: memref<2x1x64xf32, #tpu.memory_space<vmem>>, %arg19: memref<1x1x64xf32, #tpu.memory_space<vmem>>) attributes {dimension_semantics = [#tpu.dimension_semantics<parallel>], iteration_bounds = array<i64: 2>, scalar_prefetch = 0 : i64, scratch_operands = 0 : i64, tpu.core_type = #tpu.core_type<tc>, window_params = [{transform_indices = @transform_0, window_bounds = array<i64: 1, 8, 64>}, {pipeline_mode = #tpu.pipeline_mode<synchronous>, transform_indices = @transform_1, window_bounds = array<i64: 8, 64>}, {transform_indices = @transform_2, window_bounds = array<i64: 1, 8, 64>}, {transform_indices = @transform_3, window_bounds = array<i64: 1, 1, 8>}, {pipeline_mode = #tpu.pipeline_mode<synchronous>, transform_indices = @transform_4, window_bounds = array<i64: 1, 64>}, {pipeline_mode = #tpu.pipeline_mode<synchronous>, transform_indices = @transform_5, window_bounds = array<i64: 1, 64>}, {pipeline_mode = #tpu.pipeline_mode<synchronous>, transform_indices = @transform_6, window_bounds = array<i64: 2, 6, 64, 32>}, {pipeline_mode = #tpu.pipeline_mode<synchronous>, transform_indices = @transform_7, window_bounds = array<i64: 2, 6, 1, 32>}, {pipeline_mode = #tpu.pipeline_mode<synchronous>, transform_indices = @transform_8, window_bounds = array<i64: 2, 2, 32, 64>}, {pipeline_mode = #tpu.pipeline_mode<synchronous>, transform_indices = @transform_9, window_bounds = array<i64: 2, 1, 64>}, {pipeline_mode = #tpu.pipeline_mode<synchronous>, transform_indices = @transform_10, window_bounds = array<i64: 2, 1, 64>}, {pipeline_mode = #tpu.pipeline_mode<synchronous>, transform_indices = @transform_11, window_bounds = array<i64: 2, 1, 64>}, {pipeline_mode = #tpu.pipeline_mode<synchronous>, transform_indices = @transform_12, window_bounds = array<i64: 2, 64, 128>}, {pipeline_mode = #tpu.pipeline_mode<synchronous>, transform_indices = @transform_13, window_bounds = array<i64: 2, 1, 128>}, {pipeline_mode = #tpu.pipeline_mode<synchronous>, transform_indices = @transform_14, window_bounds = array<i64: 2, 128, 64>}, {pipeline_mode = #tpu.pipeline_mode<synchronous>, transform_indices = @transform_15, window_bounds = array<i64: 2, 1, 64>}, {pipeline_mode = #tpu.pipeline_mode<synchronous>, transform_indices = @transform_16, window_bounds = array<i64: 2, 1, 64>}, {pipeline_mode = #tpu.pipeline_mode<synchronous>, transform_indices = @transform_17, window_bounds = array<i64: 2, 1, 64>}, {transform_indices = @transform_18, window_bounds = array<i64: 1, 1, 64>}]} {
    %c0 = arith.constant 0 : index
    %c0_0 = arith.constant 0 : index
    %c0_1 = arith.constant 0 : index
    %0 = vector.load %arg1[%c0, %c0_0, %c0_1] : memref<1x8x64xf32, #tpu.memory_space<vmem>>, vector<1x8x64xf32>
    %1 = vector.shape_cast %0 : vector<1x8x64xf32> to vector<8x64xf32>
    %c0_2 = arith.constant 0 : index
    %c0_3 = arith.constant 0 : index
    %2 = vector.load %arg2[%c0_2, %c0_3] : memref<8x64xf32, #tpu.memory_space<vmem>>, vector<8x64xf32>
    %3 = arith.addf %1, %2 : vector<8x64xf32>
    %c0_4 = arith.constant 0 : index
    %c0_5 = arith.constant 0 : index
    %c0_6 = arith.constant 0 : index
    %4 = vector.load %arg3[%c0_4, %c0_5, %c0_6] : memref<1x8x64xf32, #tpu.memory_space<vmem>>, vector<1x8x64xf32>
    %5 = vector.shape_cast %4 : vector<1x8x64xf32> to vector<8x64xf32>
    %6 = arith.addf %3, %5 : vector<8x64xf32>
    %c0_7 = arith.constant 0 : index
    %c0_8 = arith.constant 0 : index
    %7 = vector.load %arg5[%c0_7, %c0_8] : memref<1x64xf32, #tpu.memory_space<vmem>>, vector<1x64xf32>
    %c0_9 = arith.constant 0 : index
    %c0_10 = arith.constant 0 : index
    %8 = vector.load %arg6[%c0_9, %c0_10] : memref<1x64xf32, #tpu.memory_space<vmem>>, vector<1x64xf32>
    %cst = arith.constant dense<0.000000e+00> : vector<8xf32>
    %9 = vector.multi_reduction <add>, %6, %cst [1] : vector<8x64xf32> to vector<8xf32>
    %10 = vector.shape_cast %9 : vector<8xf32> to vector<8x1xf32>
    %cst_11 = arith.constant 6.400000e+01 : f32
    %11 = vector.broadcast %cst_11 : f32 to vector<8x1xf32>
    %12 = arith.divf %10, %11 : vector<8x1xf32>
    %13 = vector.broadcast %12 : vector<8x1xf32> to vector<8x64xf32>
    %14 = arith.subf %6, %13 : vector<8x64xf32>
    %15 = arith.mulf %14, %14 : vector<8x64xf32>
    %cst_12 = arith.constant dense<0.000000e+00> : vector<8xf32>
    %16 = vector.multi_reduction <add>, %15, %cst_12 [1] : vector<8x64xf32> to vector<8xf32>
    %17 = vector.shape_cast %16 : vector<8xf32> to vector<8x1xf32>
    %cst_13 = arith.constant 6.400000e+01 : f32
    %18 = vector.broadcast %cst_13 : f32 to vector<8x1xf32>
    %19 = arith.divf %17, %18 : vector<8x1xf32>
    %20 = vector.broadcast %12 : vector<8x1xf32> to vector<8x64xf32>
    %21 = arith.subf %6, %20 : vector<8x64xf32>
    %cst_14 = arith.constant 9.99999996E-13 : f32
    %22 = vector.broadcast %cst_14 : f32 to vector<8x1xf32>
    %23 = arith.addf %19, %22 : vector<8x1xf32>
    %24 = math.rsqrt %23 : vector<8x1xf32>
    %25 = vector.broadcast %24 : vector<8x1xf32> to vector<8x64xf32>
    %26 = arith.mulf %21, %25 : vector<8x64xf32>
    %27 = vector.broadcast %7 : vector<1x64xf32> to vector<8x64xf32>
    %28 = arith.mulf %26, %27 : vector<8x64xf32>
    %29 = vector.broadcast %8 : vector<1x64xf32> to vector<8x64xf32>
    %30 = arith.addf %28, %29 : vector<8x64xf32>
    %c0_15 = arith.constant 0 : index
    %c0_16 = arith.constant 0 : index
    %c0_17 = arith.constant 0 : index
    %31 = vector.load %arg4[%c0_15, %c0_16, %c0_17] : memref<1x1x8xf32, #tpu.memory_space<vmem>>, vector<1x1x8xf32>
    %32 = vector.shape_cast %31 : vector<1x1x8xf32> to vector<1x8xf32>
    %33 = arith.truncf %30 : vector<8x64xf32> to vector<8x64xbf16>
    %c0_18 = arith.constant 0 : index
    %c0_19 = arith.constant 0 : index
    %c0_20 = arith.constant 0 : index
    %c0_21 = arith.constant 0 : index
    %34 = vector.load %arg7[%c0_18, %c0_19, %c0_20, %c0_21] : memref<2x6x64x32xbf16, #tpu.memory_space<vmem>>, vector<1x1x64x32xbf16>
    %35 = vector.shape_cast %34 : vector<1x1x64x32xbf16> to vector<64x32xbf16>
    %cst_22 = arith.constant dense<0.000000e+00> : vector<8x32xf32>
    %36 = tpu.matmul %33, %35, %cst_22 {dimension_numbers = #tpu.dot_dimension_numbers<[1], [0], [0], [1], [0, 0, 1, 1], [], []>} : vector<8x64xbf16>, vector<64x32xbf16>, vector<8x32xf32> -> vector<8x32xf32>
    %c0_23 = arith.constant 0 : index
    %c0_24 = arith.constant 0 : index
    %c0_25 = arith.constant 0 : index
    %c0_26 = arith.constant 0 : index
    %37 = vector.load %arg8[%c0_23, %c0_24, %c0_25, %c0_26] : memref<2x6x1x32xf32, #tpu.memory_space<vmem>>, vector<1x1x1x32xf32>
    %38 = vector.shape_cast %37 : vector<1x1x1x32xf32> to vector<1x32xf32>
    %39 = vector.broadcast %38 : vector<1x32xf32> to vector<8x32xf32>
    %40 = arith.addf %36, %39 : vector<8x32xf32>
    %c0_27 = arith.constant 0 : index
    %c2 = arith.constant 2 : index
    %c0_28 = arith.constant 0 : index
    %c0_29 = arith.constant 0 : index
    %41 = vector.load %arg7[%c0_27, %c2, %c0_28, %c0_29] : memref<2x6x64x32xbf16, #tpu.memory_space<vmem>>, vector<1x1x64x32xbf16>
    %42 = vector.shape_cast %41 : vector<1x1x64x32xbf16> to vector<64x32xbf16>
    %cst_30 = arith.constant dense<0.000000e+00> : vector<8x32xf32>
    %43 = tpu.matmul %33, %42, %cst_30 {dimension_numbers = #tpu.dot_dimension_numbers<[1], [0], [0], [1], [0, 0, 1, 1], [], []>} : vector<8x64xbf16>, vector<64x32xbf16>, vector<8x32xf32> -> vector<8x32xf32>
    %c0_31 = arith.constant 0 : index
    %c2_32 = arith.constant 2 : index
    %c0_33 = arith.constant 0 : index
    %c0_34 = arith.constant 0 : index
    %44 = vector.load %arg8[%c0_31, %c2_32, %c0_33, %c0_34] : memref<2x6x1x32xf32, #tpu.memory_space<vmem>>, vector<1x1x1x32xf32>
    %45 = vector.shape_cast %44 : vector<1x1x1x32xf32> to vector<1x32xf32>
    %46 = vector.broadcast %45 : vector<1x32xf32> to vector<8x32xf32>
    %47 = arith.addf %43, %46 : vector<8x32xf32>
    %c0_35 = arith.constant 0 : index
    %c4 = arith.constant 4 : index
    %c0_36 = arith.constant 0 : index
    %c0_37 = arith.constant 0 : index
    %48 = vector.load %arg7[%c0_35, %c4, %c0_36, %c0_37] : memref<2x6x64x32xbf16, #tpu.memory_space<vmem>>, vector<1x1x64x32xbf16>
    %49 = vector.shape_cast %48 : vector<1x1x64x32xbf16> to vector<64x32xbf16>
    %cst_38 = arith.constant dense<0.000000e+00> : vector<8x32xf32>
    %50 = tpu.matmul %33, %49, %cst_38 {dimension_numbers = #tpu.dot_dimension_numbers<[1], [0], [0], [1], [0, 0, 1, 1], [], []>} : vector<8x64xbf16>, vector<64x32xbf16>, vector<8x32xf32> -> vector<8x32xf32>
    %c0_39 = arith.constant 0 : index
    %c4_40 = arith.constant 4 : index
    %c0_41 = arith.constant 0 : index
    %c0_42 = arith.constant 0 : index
    %51 = vector.load %arg8[%c0_39, %c4_40, %c0_41, %c0_42] : memref<2x6x1x32xf32, #tpu.memory_space<vmem>>, vector<1x1x1x32xf32>
    %52 = vector.shape_cast %51 : vector<1x1x1x32xf32> to vector<1x32xf32>
    %53 = vector.broadcast %52 : vector<1x32xf32> to vector<8x32xf32>
    %54 = arith.addf %50, %53 : vector<8x32xf32>
    %55 = arith.truncf %40 : vector<8x32xf32> to vector<8x32xbf16>
    %56 = arith.truncf %47 : vector<8x32xf32> to vector<8x32xbf16>
    "tpu.trace_start"() <{level = 10 : i32, message = "qd,kd->qk"}> : () -> ()
    %cst_43 = arith.constant dense<0.000000e+00> : vector<8x8xf32>
    %57 = tpu.matmul %55, %56, %cst_43 {dimension_numbers = #tpu.dot_dimension_numbers<[1], [1], [0], [0], [0, 0, 1, 0], [], []>} : vector<8x32xbf16>, vector<8x32xbf16>, vector<8x8xf32> -> vector<8x8xf32>
    "tpu.trace_stop"() : () -> ()
    %cst_44 = arith.constant 0.176776692 : f32
    %58 = vector.broadcast %cst_44 : f32 to vector<8x8xf32>
    %59 = arith.mulf %57, %58 : vector<8x8xf32>
    %60 = vector.broadcast %32 : vector<1x8xf32> to vector<8x8xf32>
    %61 = arith.addf %59, %60 : vector<8x8xf32>
    %cst_45 = arith.constant dense<0xFF800000> : vector<8xf32>
    %62 = vector.multi_reduction <maximumf>, %61, %cst_45 [1] : vector<8x8xf32> to vector<8xf32>
    %63 = vector.shape_cast %62 : vector<8xf32> to vector<8x1xf32>
    %64 = vector.broadcast %63 : vector<8x1xf32> to vector<8x8xf32>
    %65 = arith.subf %61, %64 : vector<8x8xf32>
    %66 = math.exp %65 : vector<8x8xf32>
    %cst_46 = arith.constant dense<0.000000e+00> : vector<8xf32>
    %67 = vector.multi_reduction <add>, %66, %cst_46 [1] : vector<8x8xf32> to vector<8xf32>
    %68 = vector.shape_cast %67 : vector<8xf32> to vector<8x1xf32>
    %69 = tpu.reciprocal %68 {approx = true} : vector<8x1xf32> -> vector<8x1xf32>
    %70 = vector.broadcast %69 : vector<8x1xf32> to vector<8x8xf32>
    %71 = arith.mulf %66, %70 : vector<8x8xf32>
    %72 = arith.truncf %71 : vector<8x8xf32> to vector<8x8xbf16>
    %73 = arith.truncf %54 : vector<8x32xf32> to vector<8x32xbf16>
    %cst_47 = arith.constant dense<0.000000e+00> : vector<8x32xf32>
    %74 = tpu.matmul %72, %73, %cst_47 {dimension_numbers = #tpu.dot_dimension_numbers<[1], [0], [0], [1], [0, 0, 1, 1], [], []>} : vector<8x8xbf16>, vector<8x32xbf16>, vector<8x32xf32> -> vector<8x32xf32>
    %75 = arith.truncf %74 : vector<8x32xf32> to vector<8x32xbf16>
    %c0_48 = arith.constant 0 : index
    %c0_49 = arith.constant 0 : index
    %c0_50 = arith.constant 0 : index
    %c0_51 = arith.constant 0 : index
    %76 = vector.load %arg9[%c0_48, %c0_49, %c0_50, %c0_51] : memref<2x2x32x64xbf16, #tpu.memory_space<vmem>>, vector<1x1x32x64xbf16>
    %77 = vector.shape_cast %76 : vector<1x1x32x64xbf16> to vector<32x64xbf16>
    %cst_52 = arith.constant dense<0.000000e+00> : vector<8x64xf32>
    %78 = tpu.matmul %75, %77, %cst_52 {dimension_numbers = #tpu.dot_dimension_numbers<[1], [0], [0], [1], [0, 0, 1, 1], [], []>} : vector<8x32xbf16>, vector<32x64xbf16>, vector<8x64xf32> -> vector<8x64xf32>
    %c0_53 = arith.constant 0 : index
    %c1 = arith.constant 1 : index
    %c0_54 = arith.constant 0 : index
    %c0_55 = arith.constant 0 : index
    %79 = vector.load %arg7[%c0_53, %c1, %c0_54, %c0_55] : memref<2x6x64x32xbf16, #tpu.memory_space<vmem>>, vector<1x1x64x32xbf16>
    %80 = vector.shape_cast %79 : vector<1x1x64x32xbf16> to vector<64x32xbf16>
    %cst_56 = arith.constant dense<0.000000e+00> : vector<8x32xf32>
    %81 = tpu.matmul %33, %80, %cst_56 {dimension_numbers = #tpu.dot_dimension_numbers<[1], [0], [0], [1], [0, 0, 1, 1], [], []>} : vector<8x64xbf16>, vector<64x32xbf16>, vector<8x32xf32> -> vector<8x32xf32>
    %c0_57 = arith.constant 0 : index
    %c1_58 = arith.constant 1 : index
    %c0_59 = arith.constant 0 : index
    %c0_60 = arith.constant 0 : index
    %82 = vector.load %arg8[%c0_57, %c1_58, %c0_59, %c0_60] : memref<2x6x1x32xf32, #tpu.memory_space<vmem>>, vector<1x1x1x32xf32>
    %83 = vector.shape_cast %82 : vector<1x1x1x32xf32> to vector<1x32xf32>
    %84 = vector.broadcast %83 : vector<1x32xf32> to vector<8x32xf32>
    %85 = arith.addf %81, %84 : vector<8x32xf32>
    %c0_61 = arith.constant 0 : index
    %c3 = arith.constant 3 : index
    %c0_62 = arith.constant 0 : index
    %c0_63 = arith.constant 0 : index
    %86 = vector.load %arg7[%c0_61, %c3, %c0_62, %c0_63] : memref<2x6x64x32xbf16, #tpu.memory_space<vmem>>, vector<1x1x64x32xbf16>
    %87 = vector.shape_cast %86 : vector<1x1x64x32xbf16> to vector<64x32xbf16>
    %cst_64 = arith.constant dense<0.000000e+00> : vector<8x32xf32>
    %88 = tpu.matmul %33, %87, %cst_64 {dimension_numbers = #tpu.dot_dimension_numbers<[1], [0], [0], [1], [0, 0, 1, 1], [], []>} : vector<8x64xbf16>, vector<64x32xbf16>, vector<8x32xf32> -> vector<8x32xf32>
    %c0_65 = arith.constant 0 : index
    %c3_66 = arith.constant 3 : index
    %c0_67 = arith.constant 0 : index
    %c0_68 = arith.constant 0 : index
    %89 = vector.load %arg8[%c0_65, %c3_66, %c0_67, %c0_68] : memref<2x6x1x32xf32, #tpu.memory_space<vmem>>, vector<1x1x1x32xf32>
    %90 = vector.shape_cast %89 : vector<1x1x1x32xf32> to vector<1x32xf32>
    %91 = vector.broadcast %90 : vector<1x32xf32> to vector<8x32xf32>
    %92 = arith.addf %88, %91 : vector<8x32xf32>
    %c0_69 = arith.constant 0 : index
    %c5 = arith.constant 5 : index
    %c0_70 = arith.constant 0 : index
    %c0_71 = arith.constant 0 : index
    %93 = vector.load %arg7[%c0_69, %c5, %c0_70, %c0_71] : memref<2x6x64x32xbf16, #tpu.memory_space<vmem>>, vector<1x1x64x32xbf16>
    %94 = vector.shape_cast %93 : vector<1x1x64x32xbf16> to vector<64x32xbf16>
    %cst_72 = arith.constant dense<0.000000e+00> : vector<8x32xf32>
    %95 = tpu.matmul %33, %94, %cst_72 {dimension_numbers = #tpu.dot_dimension_numbers<[1], [0], [0], [1], [0, 0, 1, 1], [], []>} : vector<8x64xbf16>, vector<64x32xbf16>, vector<8x32xf32> -> vector<8x32xf32>
    %c0_73 = arith.constant 0 : index
    %c5_74 = arith.constant 5 : index
    %c0_75 = arith.constant 0 : index
    %c0_76 = arith.constant 0 : index
    %96 = vector.load %arg8[%c0_73, %c5_74, %c0_75, %c0_76] : memref<2x6x1x32xf32, #tpu.memory_space<vmem>>, vector<1x1x1x32xf32>
    %97 = vector.shape_cast %96 : vector<1x1x1x32xf32> to vector<1x32xf32>
    %98 = vector.broadcast %97 : vector<1x32xf32> to vector<8x32xf32>
    %99 = arith.addf %95, %98 : vector<8x32xf32>
    %100 = arith.truncf %85 : vector<8x32xf32> to vector<8x32xbf16>
    %101 = arith.truncf %92 : vector<8x32xf32> to vector<8x32xbf16>
    "tpu.trace_start"() <{level = 10 : i32, message = "qd,kd->qk"}> : () -> ()
    %cst_77 = arith.constant dense<0.000000e+00> : vector<8x8xf32>
    %102 = tpu.matmul %100, %101, %cst_77 {dimension_numbers = #tpu.dot_dimension_numbers<[1], [1], [0], [0], [0, 0, 1, 0], [], []>} : vector<8x32xbf16>, vector<8x32xbf16>, vector<8x8xf32> -> vector<8x8xf32>
    "tpu.trace_stop"() : () -> ()
    %cst_78 = arith.constant 0.176776692 : f32
    %103 = vector.broadcast %cst_78 : f32 to vector<8x8xf32>
    %104 = arith.mulf %102, %103 : vector<8x8xf32>
    %105 = vector.broadcast %32 : vector<1x8xf32> to vector<8x8xf32>
    %106 = arith.addf %104, %105 : vector<8x8xf32>
    %cst_79 = arith.constant dense<0xFF800000> : vector<8xf32>
    %107 = vector.multi_reduction <maximumf>, %106, %cst_79 [1] : vector<8x8xf32> to vector<8xf32>
    %108 = vector.shape_cast %107 : vector<8xf32> to vector<8x1xf32>
    %109 = vector.broadcast %108 : vector<8x1xf32> to vector<8x8xf32>
    %110 = arith.subf %106, %109 : vector<8x8xf32>
    %111 = math.exp %110 : vector<8x8xf32>
    %cst_80 = arith.constant dense<0.000000e+00> : vector<8xf32>
    %112 = vector.multi_reduction <add>, %111, %cst_80 [1] : vector<8x8xf32> to vector<8xf32>
    %113 = vector.shape_cast %112 : vector<8xf32> to vector<8x1xf32>
    %114 = tpu.reciprocal %113 {approx = true} : vector<8x1xf32> -> vector<8x1xf32>
    %115 = vector.broadcast %114 : vector<8x1xf32> to vector<8x8xf32>
    %116 = arith.mulf %111, %115 : vector<8x8xf32>
    %117 = arith.truncf %116 : vector<8x8xf32> to vector<8x8xbf16>
    %118 = arith.truncf %99 : vector<8x32xf32> to vector<8x32xbf16>
    %cst_81 = arith.constant dense<0.000000e+00> : vector<8x32xf32>
    %119 = tpu.matmul %117, %118, %cst_81 {dimension_numbers = #tpu.dot_dimension_numbers<[1], [0], [0], [1], [0, 0, 1, 1], [], []>} : vector<8x8xbf16>, vector<8x32xbf16>, vector<8x32xf32> -> vector<8x32xf32>
    %120 = arith.truncf %119 : vector<8x32xf32> to vector<8x32xbf16>
    %c0_82 = arith.constant 0 : index
    %c1_83 = arith.constant 1 : index
    %c0_84 = arith.constant 0 : index
    %c0_85 = arith.constant 0 : index
    %121 = vector.load %arg9[%c0_82, %c1_83, %c0_84, %c0_85] : memref<2x2x32x64xbf16, #tpu.memory_space<vmem>>, vector<1x1x32x64xbf16>
    %122 = vector.shape_cast %121 : vector<1x1x32x64xbf16> to vector<32x64xbf16>
    %cst_86 = arith.constant dense<0.000000e+00> : vector<8x64xf32>
    %123 = tpu.matmul %120, %122, %cst_86 {dimension_numbers = #tpu.dot_dimension_numbers<[1], [0], [0], [1], [0, 0, 1, 1], [], []>} : vector<8x32xbf16>, vector<32x64xbf16>, vector<8x64xf32> -> vector<8x64xf32>
    %124 = arith.addf %78, %123 : vector<8x64xf32>
    %c0_87 = arith.constant 0 : index
    %c0_88 = arith.constant 0 : index
    %c0_89 = arith.constant 0 : index
    %125 = vector.load %arg10[%c0_87, %c0_88, %c0_89] : memref<2x1x64xf32, #tpu.memory_space<vmem>>, vector<1x1x64xf32>
    %126 = vector.shape_cast %125 : vector<1x1x64xf32> to vector<1x64xf32>
    %127 = vector.broadcast %126 : vector<1x64xf32> to vector<8x64xf32>
    %128 = arith.addf %124, %127 : vector<8x64xf32>
    %129 = arith.addf %128, %30 : vector<8x64xf32>
    %c0_90 = arith.constant 0 : index
    %c0_91 = arith.constant 0 : index
    %c0_92 = arith.constant 0 : index
    %130 = vector.load %arg11[%c0_90, %c0_91, %c0_92] : memref<2x1x64xf32, #tpu.memory_space<vmem>>, vector<1x1x64xf32>
    %131 = vector.shape_cast %130 : vector<1x1x64xf32> to vector<1x64xf32>
    %c0_93 = arith.constant 0 : index
    %c0_94 = arith.constant 0 : index
    %c0_95 = arith.constant 0 : index
    %132 = vector.load %arg12[%c0_93, %c0_94, %c0_95] : memref<2x1x64xf32, #tpu.memory_space<vmem>>, vector<1x1x64xf32>
    %133 = vector.shape_cast %132 : vector<1x1x64xf32> to vector<1x64xf32>
    %cst_96 = arith.constant dense<0.000000e+00> : vector<8xf32>
    %134 = vector.multi_reduction <add>, %129, %cst_96 [1] : vector<8x64xf32> to vector<8xf32>
    %135 = vector.shape_cast %134 : vector<8xf32> to vector<8x1xf32>
    %cst_97 = arith.constant 6.400000e+01 : f32
    %136 = vector.broadcast %cst_97 : f32 to vector<8x1xf32>
    %137 = arith.divf %135, %136 : vector<8x1xf32>
    %138 = vector.broadcast %137 : vector<8x1xf32> to vector<8x64xf32>
    %139 = arith.subf %129, %138 : vector<8x64xf32>
    %140 = arith.mulf %139, %139 : vector<8x64xf32>
    %cst_98 = arith.constant dense<0.000000e+00> : vector<8xf32>
    %141 = vector.multi_reduction <add>, %140, %cst_98 [1] : vector<8x64xf32> to vector<8xf32>
    %142 = vector.shape_cast %141 : vector<8xf32> to vector<8x1xf32>
    %cst_99 = arith.constant 6.400000e+01 : f32
    %143 = vector.broadcast %cst_99 : f32 to vector<8x1xf32>
    %144 = arith.divf %142, %143 : vector<8x1xf32>
    %145 = vector.broadcast %137 : vector<8x1xf32> to vector<8x64xf32>
    %146 = arith.subf %129, %145 : vector<8x64xf32>
    %cst_100 = arith.constant 9.99999996E-13 : f32
    %147 = vector.broadcast %cst_100 : f32 to vector<8x1xf32>
    %148 = arith.addf %144, %147 : vector<8x1xf32>
    %149 = math.rsqrt %148 : vector<8x1xf32>
    %150 = vector.broadcast %149 : vector<8x1xf32> to vector<8x64xf32>
    %151 = arith.mulf %146, %150 : vector<8x64xf32>
    %152 = vector.broadcast %131 : vector<1x64xf32> to vector<8x64xf32>
    %153 = arith.mulf %151, %152 : vector<8x64xf32>
    %154 = vector.broadcast %133 : vector<1x64xf32> to vector<8x64xf32>
    %155 = arith.addf %153, %154 : vector<8x64xf32>
    %156 = arith.truncf %155 : vector<8x64xf32> to vector<8x64xbf16>
    %c0_101 = arith.constant 0 : index
    %c0_102 = arith.constant 0 : index
    %c0_103 = arith.constant 0 : index
    %157 = vector.load %arg13[%c0_101, %c0_102, %c0_103] : memref<2x64x128xbf16, #tpu.memory_space<vmem>>, vector<1x64x128xbf16>
    %158 = vector.shape_cast %157 : vector<1x64x128xbf16> to vector<64x128xbf16>
    %cst_104 = arith.constant dense<0.000000e+00> : vector<8x128xf32>
    %159 = tpu.matmul %156, %158, %cst_104 {dimension_numbers = #tpu.dot_dimension_numbers<[1], [0], [0], [1], [0, 0, 1, 1], [], []>} : vector<8x64xbf16>, vector<64x128xbf16>, vector<8x128xf32> -> vector<8x128xf32>
    %c0_105 = arith.constant 0 : index
    %c0_106 = arith.constant 0 : index
    %c0_107 = arith.constant 0 : index
    %160 = vector.load %arg14[%c0_105, %c0_106, %c0_107] : memref<2x1x128xf32, #tpu.memory_space<vmem>>, vector<1x1x128xf32>
    %161 = vector.shape_cast %160 : vector<1x1x128xf32> to vector<1x128xf32>
    %162 = vector.broadcast %161 : vector<1x128xf32> to vector<8x128xf32>
    %163 = arith.addf %159, %162 : vector<8x128xf32>
    %164 = arith.mulf %163, %163 : vector<8x128xf32>
    %165 = arith.mulf %163, %164 : vector<8x128xf32>
    %cst_108 = arith.constant 4.471500e-02 : f32
    %166 = vector.broadcast %cst_108 : f32 to vector<8x128xf32>
    %167 = arith.mulf %166, %165 : vector<8x128xf32>
    %168 = arith.addf %163, %167 : vector<8x128xf32>
    %cst_109 = arith.constant 0.797884583 : f32
    %169 = vector.broadcast %cst_109 : f32 to vector<8x128xf32>
    %170 = arith.mulf %169, %168 : vector<8x128xf32>
    %171 = math.tanh %170 : vector<8x128xf32>
    %cst_110 = arith.constant 1.000000e+00 : f32
    %172 = vector.broadcast %cst_110 : f32 to vector<8x128xf32>
    %173 = arith.addf %172, %171 : vector<8x128xf32>
    %cst_111 = arith.constant 5.000000e-01 : f32
    %174 = vector.broadcast %cst_111 : f32 to vector<8x128xf32>
    %175 = arith.mulf %174, %173 : vector<8x128xf32>
    %176 = arith.mulf %163, %175 : vector<8x128xf32>
    %177 = arith.truncf %176 : vector<8x128xf32> to vector<8x128xbf16>
    %c0_112 = arith.constant 0 : index
    %c0_113 = arith.constant 0 : index
    %c0_114 = arith.constant 0 : index
    %178 = vector.load %arg15[%c0_112, %c0_113, %c0_114] : memref<2x128x64xbf16, #tpu.memory_space<vmem>>, vector<1x128x64xbf16>
    %179 = vector.shape_cast %178 : vector<1x128x64xbf16> to vector<128x64xbf16>
    %cst_115 = arith.constant dense<0.000000e+00> : vector<8x64xf32>
    %180 = tpu.matmul %177, %179, %cst_115 {dimension_numbers = #tpu.dot_dimension_numbers<[1], [0], [0], [1], [0, 0, 1, 1], [], []>} : vector<8x128xbf16>, vector<128x64xbf16>, vector<8x64xf32> -> vector<8x64xf32>
    %c0_116 = arith.constant 0 : index
    %c0_117 = arith.constant 0 : index
    %c0_118 = arith.constant 0 : index
    %181 = vector.load %arg16[%c0_116, %c0_117, %c0_118] : memref<2x1x64xf32, #tpu.memory_space<vmem>>, vector<1x1x64xf32>
    %182 = vector.shape_cast %181 : vector<1x1x64xf32> to vector<1x64xf32>
    %183 = vector.broadcast %182 : vector<1x64xf32> to vector<8x64xf32>
    %184 = arith.addf %180, %183 : vector<8x64xf32>
    %185 = arith.addf %184, %155 : vector<8x64xf32>
    %c0_119 = arith.constant 0 : index
    %c0_120 = arith.constant 0 : index
    %c0_121 = arith.constant 0 : index
    %186 = vector.load %arg17[%c0_119, %c0_120, %c0_121] : memref<2x1x64xf32, #tpu.memory_space<vmem>>, vector<1x1x64xf32>
    %187 = vector.shape_cast %186 : vector<1x1x64xf32> to vector<1x64xf32>
    %c0_122 = arith.constant 0 : index
    %c0_123 = arith.constant 0 : index
    %c0_124 = arith.constant 0 : index
    %188 = vector.load %arg18[%c0_122, %c0_123, %c0_124] : memref<2x1x64xf32, #tpu.memory_space<vmem>>, vector<1x1x64xf32>
    %189 = vector.shape_cast %188 : vector<1x1x64xf32> to vector<1x64xf32>
    %cst_125 = arith.constant dense<0.000000e+00> : vector<8xf32>
    %190 = vector.multi_reduction <add>, %185, %cst_125 [1] : vector<8x64xf32> to vector<8xf32>
    %191 = vector.shape_cast %190 : vector<8xf32> to vector<8x1xf32>
    %cst_126 = arith.constant 6.400000e+01 : f32
    %192 = vector.broadcast %cst_126 : f32 to vector<8x1xf32>
    %193 = arith.divf %191, %192 : vector<8x1xf32>
    %194 = vector.broadcast %193 : vector<8x1xf32> to vector<8x64xf32>
    %195 = arith.subf %185, %194 : vector<8x64xf32>
    %196 = arith.mulf %195, %195 : vector<8x64xf32>
    %cst_127 = arith.constant dense<0.000000e+00> : vector<8xf32>
    %197 = vector.multi_reduction <add>, %196, %cst_127 [1] : vector<8x64xf32> to vector<8xf32>
    %198 = vector.shape_cast %197 : vector<8xf32> to vector<8x1xf32>
    %cst_128 = arith.constant 6.400000e+01 : f32
    %199 = vector.broadcast %cst_128 : f32 to vector<8x1xf32>
    %200 = arith.divf %198, %199 : vector<8x1xf32>
    %201 = vector.broadcast %193 : vector<8x1xf32> to vector<8x64xf32>
    %202 = arith.subf %185, %201 : vector<8x64xf32>
    %cst_129 = arith.constant 9.99999996E-13 : f32
    %203 = vector.broadcast %cst_129 : f32 to vector<8x1xf32>
    %204 = arith.addf %200, %203 : vector<8x1xf32>
    %205 = math.rsqrt %204 : vector<8x1xf32>
    %206 = vector.broadcast %205 : vector<8x1xf32> to vector<8x64xf32>
    %207 = arith.mulf %202, %206 : vector<8x64xf32>
    %208 = vector.broadcast %187 : vector<1x64xf32> to vector<8x64xf32>
    %209 = arith.mulf %207, %208 : vector<8x64xf32>
    %210 = vector.broadcast %189 : vector<1x64xf32> to vector<8x64xf32>
    %211 = arith.addf %209, %210 : vector<8x64xf32>
    %212 = arith.truncf %211 : vector<8x64xf32> to vector<8x64xbf16>
    %c1_130 = arith.constant 1 : index
    %c0_131 = arith.constant 0 : index
    %c0_132 = arith.constant 0 : index
    %c0_133 = arith.constant 0 : index
    %213 = vector.load %arg7[%c1_130, %c0_131, %c0_132, %c0_133] : memref<2x6x64x32xbf16, #tpu.memory_space<vmem>>, vector<1x1x64x32xbf16>
    %214 = vector.shape_cast %213 : vector<1x1x64x32xbf16> to vector<64x32xbf16>
    %cst_134 = arith.constant dense<0.000000e+00> : vector<8x32xf32>
    %215 = tpu.matmul %212, %214, %cst_134 {dimension_numbers = #tpu.dot_dimension_numbers<[1], [0], [0], [1], [0, 0, 1, 1], [], []>} : vector<8x64xbf16>, vector<64x32xbf16>, vector<8x32xf32> -> vector<8x32xf32>
    %c1_135 = arith.constant 1 : index
    %c0_136 = arith.constant 0 : index
    %c0_137 = arith.constant 0 : index
    %c0_138 = arith.constant 0 : index
    %216 = vector.load %arg8[%c1_135, %c0_136, %c0_137, %c0_138] : memref<2x6x1x32xf32, #tpu.memory_space<vmem>>, vector<1x1x1x32xf32>
    %217 = vector.shape_cast %216 : vector<1x1x1x32xf32> to vector<1x32xf32>
    %218 = vector.broadcast %217 : vector<1x32xf32> to vector<8x32xf32>
    %219 = arith.addf %215, %218 : vector<8x32xf32>
    %c1_139 = arith.constant 1 : index
    %c2_140 = arith.constant 2 : index
    %c0_141 = arith.constant 0 : index
    %c0_142 = arith.constant 0 : index
    %220 = vector.load %arg7[%c1_139, %c2_140, %c0_141, %c0_142] : memref<2x6x64x32xbf16, #tpu.memory_space<vmem>>, vector<1x1x64x32xbf16>
    %221 = vector.shape_cast %220 : vector<1x1x64x32xbf16> to vector<64x32xbf16>
    %cst_143 = arith.constant dense<0.000000e+00> : vector<8x32xf32>
    %222 = tpu.matmul %212, %221, %cst_143 {dimension_numbers = #tpu.dot_dimension_numbers<[1], [0], [0], [1], [0, 0, 1, 1], [], []>} : vector<8x64xbf16>, vector<64x32xbf16>, vector<8x32xf32> -> vector<8x32xf32>
    %c1_144 = arith.constant 1 : index
    %c2_145 = arith.constant 2 : index
    %c0_146 = arith.constant 0 : index
    %c0_147 = arith.constant 0 : index
    %223 = vector.load %arg8[%c1_144, %c2_145, %c0_146, %c0_147] : memref<2x6x1x32xf32, #tpu.memory_space<vmem>>, vector<1x1x1x32xf32>
    %224 = vector.shape_cast %223 : vector<1x1x1x32xf32> to vector<1x32xf32>
    %225 = vector.broadcast %224 : vector<1x32xf32> to vector<8x32xf32>
    %226 = arith.addf %222, %225 : vector<8x32xf32>
    %c1_148 = arith.constant 1 : index
    %c4_149 = arith.constant 4 : index
    %c0_150 = arith.constant 0 : index
    %c0_151 = arith.constant 0 : index
    %227 = vector.load %arg7[%c1_148, %c4_149, %c0_150, %c0_151] : memref<2x6x64x32xbf16, #tpu.memory_space<vmem>>, vector<1x1x64x32xbf16>
    %228 = vector.shape_cast %227 : vector<1x1x64x32xbf16> to vector<64x32xbf16>
    %cst_152 = arith.constant dense<0.000000e+00> : vector<8x32xf32>
    %229 = tpu.matmul %212, %228, %cst_152 {dimension_numbers = #tpu.dot_dimension_numbers<[1], [0], [0], [1], [0, 0, 1, 1], [], []>} : vector<8x64xbf16>, vector<64x32xbf16>, vector<8x32xf32> -> vector<8x32xf32>
    %c1_153 = arith.constant 1 : index
    %c4_154 = arith.constant 4 : index
    %c0_155 = arith.constant 0 : index
    %c0_156 = arith.constant 0 : index
    %230 = vector.load %arg8[%c1_153, %c4_154, %c0_155, %c0_156] : memref<2x6x1x32xf32, #tpu.memory_space<vmem>>, vector<1x1x1x32xf32>
    %231 = vector.shape_cast %230 : vector<1x1x1x32xf32> to vector<1x32xf32>
    %232 = vector.broadcast %231 : vector<1x32xf32> to vector<8x32xf32>
    %233 = arith.addf %229, %232 : vector<8x32xf32>
    %234 = arith.truncf %219 : vector<8x32xf32> to vector<8x32xbf16>
    %235 = arith.truncf %226 : vector<8x32xf32> to vector<8x32xbf16>
    "tpu.trace_start"() <{level = 10 : i32, message = "qd,kd->qk"}> : () -> ()
    %cst_157 = arith.constant dense<0.000000e+00> : vector<8x8xf32>
    %236 = tpu.matmul %234, %235, %cst_157 {dimension_numbers = #tpu.dot_dimension_numbers<[1], [1], [0], [0], [0, 0, 1, 0], [], []>} : vector<8x32xbf16>, vector<8x32xbf16>, vector<8x8xf32> -> vector<8x8xf32>
    "tpu.trace_stop"() : () -> ()
    %cst_158 = arith.constant 0.176776692 : f32
    %237 = vector.broadcast %cst_158 : f32 to vector<8x8xf32>
    %238 = arith.mulf %236, %237 : vector<8x8xf32>
    %239 = vector.broadcast %32 : vector<1x8xf32> to vector<8x8xf32>
    %240 = arith.addf %238, %239 : vector<8x8xf32>
    %cst_159 = arith.constant dense<0xFF800000> : vector<8xf32>
    %241 = vector.multi_reduction <maximumf>, %240, %cst_159 [1] : vector<8x8xf32> to vector<8xf32>
    %242 = vector.shape_cast %241 : vector<8xf32> to vector<8x1xf32>
    %243 = vector.broadcast %242 : vector<8x1xf32> to vector<8x8xf32>
    %244 = arith.subf %240, %243 : vector<8x8xf32>
    %245 = math.exp %244 : vector<8x8xf32>
    %cst_160 = arith.constant dense<0.000000e+00> : vector<8xf32>
    %246 = vector.multi_reduction <add>, %245, %cst_160 [1] : vector<8x8xf32> to vector<8xf32>
    %247 = vector.shape_cast %246 : vector<8xf32> to vector<8x1xf32>
    %248 = tpu.reciprocal %247 {approx = true} : vector<8x1xf32> -> vector<8x1xf32>
    %249 = vector.broadcast %248 : vector<8x1xf32> to vector<8x8xf32>
    %250 = arith.mulf %245, %249 : vector<8x8xf32>
    %251 = arith.truncf %250 : vector<8x8xf32> to vector<8x8xbf16>
    %252 = arith.truncf %233 : vector<8x32xf32> to vector<8x32xbf16>
    %cst_161 = arith.constant dense<0.000000e+00> : vector<8x32xf32>
    %253 = tpu.matmul %251, %252, %cst_161 {dimension_numbers = #tpu.dot_dimension_numbers<[1], [0], [0], [1], [0, 0, 1, 1], [], []>} : vector<8x8xbf16>, vector<8x32xbf16>, vector<8x32xf32> -> vector<8x32xf32>
    %254 = arith.truncf %253 : vector<8x32xf32> to vector<8x32xbf16>
    %c1_162 = arith.constant 1 : index
    %c0_163 = arith.constant 0 : index
    %c0_164 = arith.constant 0 : index
    %c0_165 = arith.constant 0 : index
    %255 = vector.load %arg9[%c1_162, %c0_163, %c0_164, %c0_165] : memref<2x2x32x64xbf16, #tpu.memory_space<vmem>>, vector<1x1x32x64xbf16>
    %256 = vector.shape_cast %255 : vector<1x1x32x64xbf16> to vector<32x64xbf16>
    %cst_166 = arith.constant dense<0.000000e+00> : vector<8x64xf32>
    %257 = tpu.matmul %254, %256, %cst_166 {dimension_numbers = #tpu.dot_dimension_numbers<[1], [0], [0], [1], [0, 0, 1, 1], [], []>} : vector<8x32xbf16>, vector<32x64xbf16>, vector<8x64xf32> -> vector<8x64xf32>
    %c1_167 = arith.constant 1 : index
    %c1_168 = arith.constant 1 : index
    %c0_169 = arith.constant 0 : index
    %c0_170 = arith.constant 0 : index
    %258 = vector.load %arg7[%c1_167, %c1_168, %c0_169, %c0_170] : memref<2x6x64x32xbf16, #tpu.memory_space<vmem>>, vector<1x1x64x32xbf16>
    %259 = vector.shape_cast %258 : vector<1x1x64x32xbf16> to vector<64x32xbf16>
    %cst_171 = arith.constant dense<0.000000e+00> : vector<8x32xf32>
    %260 = tpu.matmul %212, %259, %cst_171 {dimension_numbers = #tpu.dot_dimension_numbers<[1], [0], [0], [1], [0, 0, 1, 1], [], []>} : vector<8x64xbf16>, vector<64x32xbf16>, vector<8x32xf32> -> vector<8x32xf32>
    %c1_172 = arith.constant 1 : index
    %c1_173 = arith.constant 1 : index
    %c0_174 = arith.constant 0 : index
    %c0_175 = arith.constant 0 : index
    %261 = vector.load %arg8[%c1_172, %c1_173, %c0_174, %c0_175] : memref<2x6x1x32xf32, #tpu.memory_space<vmem>>, vector<1x1x1x32xf32>
    %262 = vector.shape_cast %261 : vector<1x1x1x32xf32> to vector<1x32xf32>
    %263 = vector.broadcast %262 : vector<1x32xf32> to vector<8x32xf32>
    %264 = arith.addf %260, %263 : vector<8x32xf32>
    %c1_176 = arith.constant 1 : index
    %c3_177 = arith.constant 3 : index
    %c0_178 = arith.constant 0 : index
    %c0_179 = arith.constant 0 : index
    %265 = vector.load %arg7[%c1_176, %c3_177, %c0_178, %c0_179] : memref<2x6x64x32xbf16, #tpu.memory_space<vmem>>, vector<1x1x64x32xbf16>
    %266 = vector.shape_cast %265 : vector<1x1x64x32xbf16> to vector<64x32xbf16>
    %cst_180 = arith.constant dense<0.000000e+00> : vector<8x32xf32>
    %267 = tpu.matmul %212, %266, %cst_180 {dimension_numbers = #tpu.dot_dimension_numbers<[1], [0], [0], [1], [0, 0, 1, 1], [], []>} : vector<8x64xbf16>, vector<64x32xbf16>, vector<8x32xf32> -> vector<8x32xf32>
    %c1_181 = arith.constant 1 : index
    %c3_182 = arith.constant 3 : index
    %c0_183 = arith.constant 0 : index
    %c0_184 = arith.constant 0 : index
    %268 = vector.load %arg8[%c1_181, %c3_182, %c0_183, %c0_184] : memref<2x6x1x32xf32, #tpu.memory_space<vmem>>, vector<1x1x1x32xf32>
    %269 = vector.shape_cast %268 : vector<1x1x1x32xf32> to vector<1x32xf32>
    %270 = vector.broadcast %269 : vector<1x32xf32> to vector<8x32xf32>
    %271 = arith.addf %267, %270 : vector<8x32xf32>
    %c1_185 = arith.constant 1 : index
    %c5_186 = arith.constant 5 : index
    %c0_187 = arith.constant 0 : index
    %c0_188 = arith.constant 0 : index
    %272 = vector.load %arg7[%c1_185, %c5_186, %c0_187, %c0_188] : memref<2x6x64x32xbf16, #tpu.memory_space<vmem>>, vector<1x1x64x32xbf16>
    %273 = vector.shape_cast %272 : vector<1x1x64x32xbf16> to vector<64x32xbf16>
    %cst_189 = arith.constant dense<0.000000e+00> : vector<8x32xf32>
    %274 = tpu.matmul %212, %273, %cst_189 {dimension_numbers = #tpu.dot_dimension_numbers<[1], [0], [0], [1], [0, 0, 1, 1], [], []>} : vector<8x64xbf16>, vector<64x32xbf16>, vector<8x32xf32> -> vector<8x32xf32>
    %c1_190 = arith.constant 1 : index
    %c5_191 = arith.constant 5 : index
    %c0_192 = arith.constant 0 : index
    %c0_193 = arith.constant 0 : index
    %275 = vector.load %arg8[%c1_190, %c5_191, %c0_192, %c0_193] : memref<2x6x1x32xf32, #tpu.memory_space<vmem>>, vector<1x1x1x32xf32>
    %276 = vector.shape_cast %275 : vector<1x1x1x32xf32> to vector<1x32xf32>
    %277 = vector.broadcast %276 : vector<1x32xf32> to vector<8x32xf32>
    %278 = arith.addf %274, %277 : vector<8x32xf32>
    %279 = arith.truncf %264 : vector<8x32xf32> to vector<8x32xbf16>
    %280 = arith.truncf %271 : vector<8x32xf32> to vector<8x32xbf16>
    "tpu.trace_start"() <{level = 10 : i32, message = "qd,kd->qk"}> : () -> ()
    %cst_194 = arith.constant dense<0.000000e+00> : vector<8x8xf32>
    %281 = tpu.matmul %279, %280, %cst_194 {dimension_numbers = #tpu.dot_dimension_numbers<[1], [1], [0], [0], [0, 0, 1, 0], [], []>} : vector<8x32xbf16>, vector<8x32xbf16>, vector<8x8xf32> -> vector<8x8xf32>
    "tpu.trace_stop"() : () -> ()
    %cst_195 = arith.constant 0.176776692 : f32
    %282 = vector.broadcast %cst_195 : f32 to vector<8x8xf32>
    %283 = arith.mulf %281, %282 : vector<8x8xf32>
    %284 = vector.broadcast %32 : vector<1x8xf32> to vector<8x8xf32>
    %285 = arith.addf %283, %284 : vector<8x8xf32>
    %cst_196 = arith.constant dense<0xFF800000> : vector<8xf32>
    %286 = vector.multi_reduction <maximumf>, %285, %cst_196 [1] : vector<8x8xf32> to vector<8xf32>
    %287 = vector.shape_cast %286 : vector<8xf32> to vector<8x1xf32>
    %288 = vector.broadcast %287 : vector<8x1xf32> to vector<8x8xf32>
    %289 = arith.subf %285, %288 : vector<8x8xf32>
    %290 = math.exp %289 : vector<8x8xf32>
    %cst_197 = arith.constant dense<0.000000e+00> : vector<8xf32>
    %291 = vector.multi_reduction <add>, %290, %cst_197 [1] : vector<8x8xf32> to vector<8xf32>
    %292 = vector.shape_cast %291 : vector<8xf32> to vector<8x1xf32>
    %293 = tpu.reciprocal %292 {approx = true} : vector<8x1xf32> -> vector<8x1xf32>
    %294 = vector.broadcast %293 : vector<8x1xf32> to vector<8x8xf32>
    %295 = arith.mulf %290, %294 : vector<8x8xf32>
    %296 = arith.truncf %295 : vector<8x8xf32> to vector<8x8xbf16>
    %297 = arith.truncf %278 : vector<8x32xf32> to vector<8x32xbf16>
    %cst_198 = arith.constant dense<0.000000e+00> : vector<8x32xf32>
    %298 = tpu.matmul %296, %297, %cst_198 {dimension_numbers = #tpu.dot_dimension_numbers<[1], [0], [0], [1], [0, 0, 1, 1], [], []>} : vector<8x8xbf16>, vector<8x32xbf16>, vector<8x32xf32> -> vector<8x32xf32>
    %299 = arith.truncf %298 : vector<8x32xf32> to vector<8x32xbf16>
    %c1_199 = arith.constant 1 : index
    %c1_200 = arith.constant 1 : index
    %c0_201 = arith.constant 0 : index
    %c0_202 = arith.constant 0 : index
    %300 = vector.load %arg9[%c1_199, %c1_200, %c0_201, %c0_202] : memref<2x2x32x64xbf16, #tpu.memory_space<vmem>>, vector<1x1x32x64xbf16>
    %301 = vector.shape_cast %300 : vector<1x1x32x64xbf16> to vector<32x64xbf16>
    %cst_203 = arith.constant dense<0.000000e+00> : vector<8x64xf32>
    %302 = tpu.matmul %299, %301, %cst_203 {dimension_numbers = #tpu.dot_dimension_numbers<[1], [0], [0], [1], [0, 0, 1, 1], [], []>} : vector<8x32xbf16>, vector<32x64xbf16>, vector<8x64xf32> -> vector<8x64xf32>
    %303 = arith.addf %257, %302 : vector<8x64xf32>
    %c1_204 = arith.constant 1 : index
    %c0_205 = arith.constant 0 : index
    %c0_206 = arith.constant 0 : index
    %304 = vector.load %arg10[%c1_204, %c0_205, %c0_206] : memref<2x1x64xf32, #tpu.memory_space<vmem>>, vector<1x1x64xf32>
    %305 = vector.shape_cast %304 : vector<1x1x64xf32> to vector<1x64xf32>
    %306 = vector.broadcast %305 : vector<1x64xf32> to vector<8x64xf32>
    %307 = arith.addf %303, %306 : vector<8x64xf32>
    %308 = arith.addf %307, %211 : vector<8x64xf32>
    %c1_207 = arith.constant 1 : index
    %c0_208 = arith.constant 0 : index
    %c0_209 = arith.constant 0 : index
    %309 = vector.load %arg11[%c1_207, %c0_208, %c0_209] : memref<2x1x64xf32, #tpu.memory_space<vmem>>, vector<1x1x64xf32>
    %310 = vector.shape_cast %309 : vector<1x1x64xf32> to vector<1x64xf32>
    %c1_210 = arith.constant 1 : index
    %c0_211 = arith.constant 0 : index
    %c0_212 = arith.constant 0 : index
    %311 = vector.load %arg12[%c1_210, %c0_211, %c0_212] : memref<2x1x64xf32, #tpu.memory_space<vmem>>, vector<1x1x64xf32>
    %312 = vector.shape_cast %311 : vector<1x1x64xf32> to vector<1x64xf32>
    %cst_213 = arith.constant dense<0.000000e+00> : vector<8xf32>
    %313 = vector.multi_reduction <add>, %308, %cst_213 [1] : vector<8x64xf32> to vector<8xf32>
    %314 = vector.shape_cast %313 : vector<8xf32> to vector<8x1xf32>
    %cst_214 = arith.constant 6.400000e+01 : f32
    %315 = vector.broadcast %cst_214 : f32 to vector<8x1xf32>
    %316 = arith.divf %314, %315 : vector<8x1xf32>
    %317 = vector.broadcast %316 : vector<8x1xf32> to vector<8x64xf32>
    %318 = arith.subf %308, %317 : vector<8x64xf32>
    %319 = arith.mulf %318, %318 : vector<8x64xf32>
    %cst_215 = arith.constant dense<0.000000e+00> : vector<8xf32>
    %320 = vector.multi_reduction <add>, %319, %cst_215 [1] : vector<8x64xf32> to vector<8xf32>
    %321 = vector.shape_cast %320 : vector<8xf32> to vector<8x1xf32>
    %cst_216 = arith.constant 6.400000e+01 : f32
    %322 = vector.broadcast %cst_216 : f32 to vector<8x1xf32>
    %323 = arith.divf %321, %322 : vector<8x1xf32>
    %324 = vector.broadcast %316 : vector<8x1xf32> to vector<8x64xf32>
    %325 = arith.subf %308, %324 : vector<8x64xf32>
    %cst_217 = arith.constant 9.99999996E-13 : f32
    %326 = vector.broadcast %cst_217 : f32 to vector<8x1xf32>
    %327 = arith.addf %323, %326 : vector<8x1xf32>
    %328 = math.rsqrt %327 : vector<8x1xf32>
    %329 = vector.broadcast %328 : vector<8x1xf32> to vector<8x64xf32>
    %330 = arith.mulf %325, %329 : vector<8x64xf32>
    %331 = vector.broadcast %310 : vector<1x64xf32> to vector<8x64xf32>
    %332 = arith.mulf %330, %331 : vector<8x64xf32>
    %333 = vector.broadcast %312 : vector<1x64xf32> to vector<8x64xf32>
    %334 = arith.addf %332, %333 : vector<8x64xf32>
    %335 = arith.truncf %334 : vector<8x64xf32> to vector<8x64xbf16>
    %c1_218 = arith.constant 1 : index
    %c0_219 = arith.constant 0 : index
    %c0_220 = arith.constant 0 : index
    %336 = vector.load %arg13[%c1_218, %c0_219, %c0_220] : memref<2x64x128xbf16, #tpu.memory_space<vmem>>, vector<1x64x128xbf16>
    %337 = vector.shape_cast %336 : vector<1x64x128xbf16> to vector<64x128xbf16>
    %cst_221 = arith.constant dense<0.000000e+00> : vector<8x128xf32>
    %338 = tpu.matmul %335, %337, %cst_221 {dimension_numbers = #tpu.dot_dimension_numbers<[1], [0], [0], [1], [0, 0, 1, 1], [], []>} : vector<8x64xbf16>, vector<64x128xbf16>, vector<8x128xf32> -> vector<8x128xf32>
    %c1_222 = arith.constant 1 : index
    %c0_223 = arith.constant 0 : index
    %c0_224 = arith.constant 0 : index
    %339 = vector.load %arg14[%c1_222, %c0_223, %c0_224] : memref<2x1x128xf32, #tpu.memory_space<vmem>>, vector<1x1x128xf32>
    %340 = vector.shape_cast %339 : vector<1x1x128xf32> to vector<1x128xf32>
    %341 = vector.broadcast %340 : vector<1x128xf32> to vector<8x128xf32>
    %342 = arith.addf %338, %341 : vector<8x128xf32>
    %343 = arith.mulf %342, %342 : vector<8x128xf32>
    %344 = arith.mulf %342, %343 : vector<8x128xf32>
    %cst_225 = arith.constant 4.471500e-02 : f32
    %345 = vector.broadcast %cst_225 : f32 to vector<8x128xf32>
    %346 = arith.mulf %345, %344 : vector<8x128xf32>
    %347 = arith.addf %342, %346 : vector<8x128xf32>
    %cst_226 = arith.constant 0.797884583 : f32
    %348 = vector.broadcast %cst_226 : f32 to vector<8x128xf32>
    %349 = arith.mulf %348, %347 : vector<8x128xf32>
    %350 = math.tanh %349 : vector<8x128xf32>
    %cst_227 = arith.constant 1.000000e+00 : f32
    %351 = vector.broadcast %cst_227 : f32 to vector<8x128xf32>
    %352 = arith.addf %351, %350 : vector<8x128xf32>
    %cst_228 = arith.constant 5.000000e-01 : f32
    %353 = vector.broadcast %cst_228 : f32 to vector<8x128xf32>
    %354 = arith.mulf %353, %352 : vector<8x128xf32>
    %355 = arith.mulf %342, %354 : vector<8x128xf32>
    %356 = arith.truncf %355 : vector<8x128xf32> to vector<8x128xbf16>
    %c1_229 = arith.constant 1 : index
    %c0_230 = arith.constant 0 : index
    %c0_231 = arith.constant 0 : index
    %357 = vector.load %arg15[%c1_229, %c0_230, %c0_231] : memref<2x128x64xbf16, #tpu.memory_space<vmem>>, vector<1x128x64xbf16>
    %358 = vector.shape_cast %357 : vector<1x128x64xbf16> to vector<128x64xbf16>
    %cst_232 = arith.constant dense<0.000000e+00> : vector<8x64xf32>
    %359 = tpu.matmul %356, %358, %cst_232 {dimension_numbers = #tpu.dot_dimension_numbers<[1], [0], [0], [1], [0, 0, 1, 1], [], []>} : vector<8x128xbf16>, vector<128x64xbf16>, vector<8x64xf32> -> vector<8x64xf32>
    %c1_233 = arith.constant 1 : index
    %c0_234 = arith.constant 0 : index
    %c0_235 = arith.constant 0 : index
    %360 = vector.load %arg16[%c1_233, %c0_234, %c0_235] : memref<2x1x64xf32, #tpu.memory_space<vmem>>, vector<1x1x64xf32>
    %361 = vector.shape_cast %360 : vector<1x1x64xf32> to vector<1x64xf32>
    %362 = vector.broadcast %361 : vector<1x64xf32> to vector<8x64xf32>
    %363 = arith.addf %359, %362 : vector<8x64xf32>
    %364 = arith.addf %363, %334 : vector<8x64xf32>
    %c1_236 = arith.constant 1 : index
    %c0_237 = arith.constant 0 : index
    %c0_238 = arith.constant 0 : index
    %365 = vector.load %arg17[%c1_236, %c0_237, %c0_238] : memref<2x1x64xf32, #tpu.memory_space<vmem>>, vector<1x1x64xf32>
    %366 = vector.shape_cast %365 : vector<1x1x64xf32> to vector<1x64xf32>
    %c1_239 = arith.constant 1 : index
    %c0_240 = arith.constant 0 : index
    %c0_241 = arith.constant 0 : index
    %367 = vector.load %arg18[%c1_239, %c0_240, %c0_241] : memref<2x1x64xf32, #tpu.memory_space<vmem>>, vector<1x1x64xf32>
    %368 = vector.shape_cast %367 : vector<1x1x64xf32> to vector<1x64xf32>
    %cst_242 = arith.constant dense<0.000000e+00> : vector<8xf32>
    %369 = vector.multi_reduction <add>, %364, %cst_242 [1] : vector<8x64xf32> to vector<8xf32>
    %370 = vector.shape_cast %369 : vector<8xf32> to vector<8x1xf32>
    %cst_243 = arith.constant 6.400000e+01 : f32
    %371 = vector.broadcast %cst_243 : f32 to vector<8x1xf32>
    %372 = arith.divf %370, %371 : vector<8x1xf32>
    %373 = vector.broadcast %372 : vector<8x1xf32> to vector<8x64xf32>
    %374 = arith.subf %364, %373 : vector<8x64xf32>
    %375 = arith.mulf %374, %374 : vector<8x64xf32>
    %cst_244 = arith.constant dense<0.000000e+00> : vector<8xf32>
    %376 = vector.multi_reduction <add>, %375, %cst_244 [1] : vector<8x64xf32> to vector<8xf32>
    %377 = vector.shape_cast %376 : vector<8xf32> to vector<8x1xf32>
    %cst_245 = arith.constant 6.400000e+01 : f32
    %378 = vector.broadcast %cst_245 : f32 to vector<8x1xf32>
    %379 = arith.divf %377, %378 : vector<8x1xf32>
    %380 = vector.broadcast %372 : vector<8x1xf32> to vector<8x64xf32>
    %381 = arith.subf %364, %380 : vector<8x64xf32>
    %cst_246 = arith.constant 9.99999996E-13 : f32
    %382 = vector.broadcast %cst_246 : f32 to vector<8x1xf32>
    %383 = arith.addf %379, %382 : vector<8x1xf32>
    %384 = math.rsqrt %383 : vector<8x1xf32>
    %385 = vector.broadcast %384 : vector<8x1xf32> to vector<8x64xf32>
    %386 = arith.mulf %381, %385 : vector<8x64xf32>
    %387 = vector.broadcast %366 : vector<1x64xf32> to vector<8x64xf32>
    %388 = arith.mulf %386, %387 : vector<8x64xf32>
    %389 = vector.broadcast %368 : vector<1x64xf32> to vector<8x64xf32>
    %390 = arith.addf %388, %389 : vector<8x64xf32>
    %391 = vector.extract_strided_slice %390 {offsets = [0, 0], sizes = [1, 64], strides = [1, 1]} : vector<8x64xf32> to vector<1x64xf32>
    %c0_247 = arith.constant 0 : index
    %c0_248 = arith.constant 0 : index
    %c0_249 = arith.constant 0 : index
    %392 = vector.load %arg19[%c0_247, %c0_248, %c0_249] : memref<1x1x64xf32, #tpu.memory_space<vmem>>, vector<1x1x64xf32>
    %393 = vector.shape_cast %392 : vector<1x1x64xf32> to vector<1x64xf32>
    %394 = vector.shape_cast %391 : vector<1x64xf32> to vector<1x1x64xf32>
    tpu.vector_store %arg19[%c0_247, %c0_248, %c0_249], %394 {strides = array<i32>} : memref<1x1x64xf32, #tpu.memory_space<vmem>>, vector<1x1x64xf32>,
    return
  }
  func.func @transform_0(%arg0: i32) -> (i32, i32, i32) {
    %c0_i32 = arith.constant 0 : i32
    %c0_i32_0 = arith.constant 0 : i32
    %c0_i32_1 = arith.constant 0 : i32
    return %arg0, %c0_i32, %c0_i32_0 : i32, i32, i32
  }
  func.func @transform_1(%arg0: i32) -> (i32, i32) {
    %c0_i32 = arith.constant 0 : i32
    %c0_i32_0 = arith.constant 0 : i32
    %c0_i32_1 = arith.constant 0 : i32
    return %c0_i32, %c0_i32_0 : i32, i32
  }
  func.func @transform_2(%arg0: i32) -> (i32, i32, i32) {
    %c0_i32 = arith.constant 0 : i32
    %c0_i32_0 = arith.constant 0 : i32
    %c0_i32_1 = arith.constant 0 : i32
    return %arg0, %c0_i32, %c0_i32_0 : i32, i32, i32
  }
  func.func @transform_3(%arg0: i32) -> (i32, i32, i32) {
    %c0_i32 = arith.constant 0 : i32
    %c0_i32_0 = arith.constant 0 : i32
    %c0_i32_1 = arith.constant 0 : i32
    return %arg0, %c0_i32, %c0_i32_0 : i32, i32, i32
  }
  func.func @transform_4(%arg0: i32) -> (i32, i32) {
    %c0_i32 = arith.constant 0 : i32
    %c0_i32_0 = arith.constant 0 : i32
    %c0_i32_1 = arith.constant 0 : i32
    return %c0_i32, %c0_i32_0 : i32, i32
  }
  func.func @transform_5(%arg0: i32) -> (i32, i32) {
    %c0_i32 = arith.constant 0 : i32
    %c0_i32_0 = arith.constant 0 : i32
    %c0_i32_1 = arith.constant 0 : i32
    return %c0_i32, %c0_i32_0 : i32, i32
  }
  func.func @transform_6(%arg0: i32) -> (i32, i32, i32, i32) {
    %c0_i32 = arith.constant 0 : i32
    %c0_i32_0 = arith.constant 0 : i32
    %c0_i32_1 = arith.constant 0 : i32
    %c0_i32_2 = arith.constant 0 : i32
    %c0_i32_3 = arith.constant 0 : i32
    return %c0_i32, %c0_i32_0, %c0_i32_1, %c0_i32_2 : i32, i32, i32, i32
  }
  func.func @transform_7(%arg0: i32) -> (i32, i32, i32, i32) {
    %c0_i32 = arith.constant 0 : i32
    %c0_i32_0 = arith.constant 0 : i32
    %c0_i32_1 = arith.constant 0 : i32
    %c0_i32_2 = arith.constant 0 : i32
    %c0_i32_3 = arith.constant 0 : i32
    return %c0_i32, %c0_i32_0, %c0_i32_1, %c0_i32_2 : i32, i32, i32, i32
  }
  func.func @transform_8(%arg0: i32) -> (i32, i32, i32, i32) {
    %c0_i32 = arith.constant 0 : i32
    %c0_i32_0 = arith.constant 0 : i32
    %c0_i32_1 = arith.constant 0 : i32
    %c0_i32_2 = arith.constant 0 : i32
    %c0_i32_3 = arith.constant 0 : i32
    return %c0_i32, %c0_i32_0, %c0_i32_1, %c0_i32_2 : i32, i32, i32, i32
  }
  func.func @transform_9(%arg0: i32) -> (i32, i32, i32) {
    %c0_i32 = arith.constant 0 : i32
    %c0_i32_0 = arith.constant 0 : i32
    %c0_i32_1 = arith.constant 0 : i32
    %c0_i32_2 = arith.constant 0 : i32
    return %c0_i32, %c0_i32_0, %c0_i32_1 : i32, i32, i32
  }
  func.func @transform_10(%arg0: i32) -> (i32, i32, i32) {
    %c0_i32 = arith.constant 0 : i32
    %c0_i32_0 = arith.constant 0 : i32
    %c0_i32_1 = arith.constant 0 : i32
    %c0_i32_2 = arith.constant 0 : i32
    return %c0_i32, %c0_i32_0, %c0_i32_1 : i32, i32, i32
  }
  func.func @transform_11(%arg0: i32) -> (i32, i32, i32) {
    %c0_i32 = arith.constant 0 : i32
    %c0_i32_0 = arith.constant 0 : i32
    %c0_i32_1 = arith.constant 0 : i32
    %c0_i32_2 = arith.constant 0 : i32
    return %c0_i32, %c0_i32_0, %c0_i32_1 : i32, i32, i32
  }
  func.func @transform_12(%arg0: i32) -> (i32, i32, i32) {
    %c0_i32 = arith.constant 0 : i32
    %c0_i32_0 = arith.constant 0 : i32
    %c0_i32_1 = arith.constant 0 : i32
    %c0_i32_2 = arith.constant 0 : i32
    return %c0_i32, %c0_i32_0, %c0_i32_1 : i32, i32, i32
  }
  func.func @transform_13(%arg0: i32) -> (i32, i32, i32) {
    %c0_i32 = arith.constant 0 : i32
    %c0_i32_0 = arith.constant 0 : i32
    %c0_i32_1 = arith.constant 0 : i32
    %c0_i32_2 = arith.constant 0 : i32
    return %c0_i32, %c0_i32_0, %c0_i32_1 : i32, i32, i32
  }
  func.func @transform_14(%arg0: i32) -> (i32, i32, i32) {
    %c0_i32 = arith.constant 0 : i32
    %c0_i32_0 = arith.constant 0 : i32
    %c0_i32_1 = arith.constant 0 : i32
    %c0_i32_2 = arith.constant 0 : i32
    return %c0_i32, %c0_i32_0, %c0_i32_1 : i32, i32, i32
  }
  func.func @transform_15(%arg0: i32) -> (i32, i32, i32) {
    %c0_i32 = arith.constant 0 : i32
    %c0_i32_0 = arith.constant 0 : i32
    %c0_i32_1 = arith.constant 0 : i32
    %c0_i32_2 = arith.constant 0 : i32
    return %c0_i32, %c0_i32_0, %c0_i32_1 : i32, i32, i32
  }
  func.func @transform_16(%arg0: i32) -> (i32, i32, i32) {
    %c0_i32 = arith.constant 0 : i32
    %c0_i32_0 = arith.constant 0 : i32
    %c0_i32_1 = arith.constant 0 : i32
    %c0_i32_2 = arith.constant 0 : i32
    return %c0_i32, %c0_i32_0, %c0_i32_1 : i32, i32, i32
  }
  func.func @transform_17(%arg0: i32) -> (i32, i32, i32) {
    %c0_i32 = arith.constant 0 : i32
    %c0_i32_0 = arith.constant 0 : i32
    %c0_i32_1 = arith.constant 0 : i32
    %c0_i32_2 = arith.constant 0 : i32
    return %c0_i32, %c0_i32_0, %c0_i32_1 : i32, i32, i32
  }
  func.func @transform_18(%arg0: i32) -> (i32, i32, i32) {
    %c0_i32 = arith.constant 0 : i32
    %c0_i32_0 = arith.constant 0 : i32
    %c0_i32_1 = arith.constant 0 : i32
    return %arg0, %c0_i32, %c0_i32_0 : i32, i32, i32
  }
}

</mosaic_0001>

<bundles_post_ra>
// kernel: neural_network_forward.1
= control target key start
LH: loop header
LB: loop body
LE: loop exit
PB: predicated region body
PF: predicated region fallthrough
CT: control target
= control target key end

     0   :  { %s4617_s0 = inlined_call_operand.vmem [shape: f32[2,8,64], index: 0, kind: input, shape index: {}]   ;;  %s4618_s1 = inlined_call_operand.vmem [shape: f32[8,64], index: 1, kind: input, shape index: {}]   ;;  %s4619_s2 = inlined_call_operand.vmem [shape: f32[2,8,64], index: 2, kind: input, shape index: {}]   ;;  %s4620_s3 = inlined_call_operand.vmem [shape: f32[2,1,8], index: 3, kind: input, shape index: {}]   ;;  %s4621_s4 = inlined_call_operand.vmem [shape: f32[1,64], index: 4, kind: input, shape index: {}]   ;;  %s4622_s5 = inlined_call_operand.vmem [shape: f32[1,64], index: 5, kind: input, shape index: {}]   ;;  %s4623_s6 = inlined_call_operand.vmem [shape: bf16[2,6,64,32], index: 6, kind: input, shape index: {}]   ;;  %s4624_s7 = inlined_call_operand.vmem [shape: f32[2,6,1,32], index: 7, kind: input, shape index: {}]   ;;  %s4625_s8 = inlined_call_operand.vmem [shape: bf16[2,2,32,64], index: 8, kind: input, shape index: {}]   ;;  %s4626_s9 = inlined_call_operand.vmem [shape: f32[2,1,64], index: 9, kind: input, shape index: {}]   ;;  %s4627_s10 = inlined_call_operand.vmem [shape: f32[2,1,64], index: 10, kind: input, shape index: {}]   ;;  %s4628_s11 = inlined_call_operand.vmem [shape: f32[2,1,64], index: 11, kind: input, shape index: {}]   ;;  %s4629_s12 = inlined_call_operand.vmem [shape: bf16[2,64,128], index: 12, kind: input, shape index: {}]   ;;  %s4630_s13 = inlined_call_operand.vmem [shape: f32[2,1,128], index: 13, kind: input, shape index: {}]   ;;  %s4631_s14 = inlined_call_operand.vmem [shape: bf16[2,128,64], index: 14, kind: input, shape index: {}]   ;;  %s4632_s15 = inlined_call_operand.vmem [shape: f32[2,1,64], index: 15, kind: input, shape index: {}]   ;;  %s4633_s16 = inlined_call_operand.vmem [shape: f32[2,1,64], index: 16, kind: input, shape index: {}]   ;;  %s4634_s17 = inlined_call_operand.vmem [shape: f32[2,1,64], index: 17, kind: input, shape index: {}]   ;;  %s4635_s18 = inlined_call_operand.hbm [shape: f32[2,1,64], index: 18, kind: output, shape index: {}]  }
   0x1   :  { %4643 = sst [smem:[#allocation11_spill]] %s4617_s0 }
   0x2   :  { %4644 = sst [smem:[#allocation12_spill]] %s4618_s1 }
   0x3   :  { %4645 = sst [smem:[#allocation13_spill]] %s4619_s2 }
   0x4   :  { %4646 = sst [smem:[#allocation14_spill]] %s4635_s18 }
   0x5   :  { %23 = vsyncpa [#allocation3], 0 }
   0x6   :  { %25 = vsyncpa [#allocation3 + $0x1], 0  ;;  %s3952_s27 = smov 0   ;;  %s3954_s28 = smov 0  }
   0x7   :  { %s3956_s29 = smov 0   ;;  %s3958_s30 = smov 0  }
   0x8 LB: > { %4647 = sst [smem:[#allocation5_spill]] %s3840_s27  ;;  %s3973_s0 = sadd.s32 4294967295, %s3852_s30   ;;  %s3852_s30 = sphi %s3958_s30, %s4662_s30   ;;  %s3848_s29 = sphi %s3956_s29, %s4664_s29   ;;  %s3844_s28 = sphi %s3954_s28, %s4666_s28   ;;  %s3840_s27 = sphi %s3952_s27, %s4665_s27  }
   0x9   : > { %4648 = sst [smem:[#allocation6_spill]] %s3848_s29  ;;  %s2949_s19 = sadd.s32 4294967294, %s3852_s30  }
   0xa   : > { %4649 = sst [smem:[#allocation7_spill]] %s3852_s30  ;;  %s3977_s1 = sadd.s32 1, %s3852_s30  }
   0xb   : > { %4650 = sst [smem:[#allocation8_spill]] %s3977_s1  ;;  %s431_s20 = sadd.s32 1, %s3848_s29 }
   0xc   : > { %s428_s21 = ssub.s32 %s3852_s30, %s3977_s1  ;;  %p441_p0 = scmp.ne.s32.totalorder %s3848_s29, %s3844_s28 }
   0xd   : > { %p429_p1 = scmp.eq.s32.totalorder %s428_s21, 0  ;;  %p442_p2 = scmp.eq.s32.totalorder %s3973_s0, 1 }
   0xe   : > { %p447_p3 = scmp.ne.s32.totalorder %s3844_s28, %s3840_s27  ;;  %p448_p4 = scmp.eq.s32.totalorder %s2949_s19, 1 }
   0xf   : > { %s3988_s22 = scalar_select %p429_p1, %s3848_s29, %s431_s20  }
  0x10   : > { %p3990_p5 = por %p442_p2, %p441_p0  ;;  %p3994_p6 = por %p448_p4, %p447_p3 }
  0x11   : > { %4651 = sst [smem:[#allocation9_spill]] %s3988_s22  ;;  %p2952_p7 = scmp.ge.s32.totalorder %s3852_s30, 1 }
  0x12   : > { %s4653_s23 = scalar_select %p3994_p6, 1, 0 }
  0x13   : > { %p531_p8 = scmp.lt.s32.totalorder %s3852_s30, 3 }
  0x14   : > { %4654 = sst [smem:[#allocation10_spill]] %s4653_s23 }
  0x15   : > { %p532_p9 = pnand %p2952_p7, %p531_p8 }
  0x16   : > { %p590_p10 = scmp.lt.s32.totalorder (!%p532_p9), %s3973_s0, 1  ;;  %s4655_s20 = sld [smem:[#allocation12_spill]] (!%p532_p9)  ;;  %vm609_vm0 = vcmask (!%p532_p9), 523264   ;;  %v3680_v11 = vld [vmem:[%s4623_s6] sm:$0xff] (!%p532_p9)   ;;  %v3854_v12 = vmov (!%p532_p9), 0.0   ;;  %v3682_v14 = vld [vmem:[%s4623_s6 + $0x8] sm:$0xff] (!%p532_p9)  }
  0x17   : > { %535 = sbr.rel (%p532_p9) target bundleno = 6480 (0x1950), region = 92  ;;  %s4656_s29 = sld [smem:[#allocation11_spill]] (!%p532_p9)  ;;  %3351 = vmatprep.subr.bf16.mxu0 (!%p532_p9), %v3854_v12  ;;  %3363 = vmatprep.subr.bf16.mxu1 (!%p532_p9), %v3854_v12  ;;  %v3681_v13 = vld [vmem:[%s4623_s6 + $0x40] sm:$0xff] (!%p532_p9)   ;;  %v3683_v15 = vld [vmem:[%s4623_s6 + $0x48] sm:$0xff] (!%p532_p9)   ;;  %v3684_v16 = vld [vmem:[%s4623_s6 + $0x10] sm:$0xff] (!%p532_p9)   ;;  %vm3855_vm1 = vmmov (!%p532_p9), 0  }
  0x18   : > { %s4657_s30 = sld [smem:[#allocation13_spill]] (!%p532_p9)  ;;  %3352 = vmatpush3.bf16.msra.mxu0 (!%p532_p9), %v3680_v11  ;;  %3364 = vmatpush3.bf16.msra.mxu1 (!%p532_p9), %v3681_v13  ;;  %v3685_v17 = vld [vmem:[%s4623_s6 + $0x50] sm:$0xff] (!%p532_p9)   ;;  %v3686_v18 = vld [vmem:[%s4623_s6 + $0x18] sm:$0xff] (!%p532_p9)   ;;  %v2955_v24 = vld [vmem:[%s4621_s4] ss:$0 sm:$0xff] (!%p532_p9)  ;;  %vm886_vm2 = vcmask (!%p532_p9), 261120  }
  0x19   : > { %3353 = vmatprep.subr.bf16.mxu0 (!%p532_p9), %v3854_v12  ;;  %3365 = vmatprep.subr.bf16.mxu1 (!%p532_p9), %v3854_v12  ;;  %v3687_v19 = vld [vmem:[%s4623_s6 + $0x58] sm:$0xff] (!%p532_p9)   ;;  %v2956_v26 = vld [vmem:[%s4622_s5] ss:$0 sm:$0xff] (!%p532_p9)  ;;  %v3689_v31 = vld [vmem:[%s4623_s6 + $0x88] sm:$0xff] (!%p532_p9)   ;;  %vm958_vm3 = vcmask (!%p532_p9), 1043456   ;;  %vm941_vm4 = vcmask (!%p532_p9), 64512  }
  0x1a   : > { %3359 = vmatprep.mubr.msk.bf16.mxu0 (!%p532_p9), %vm3855_vm1, %v3854_v12  ;;  %3371 = vmatprep.mubr.msk.bf16.mxu1 (!%p532_p9), %vm3855_vm1, %v3854_v12  ;;  %v3688_v29 = vld [vmem:[%s4623_s6 + $0x80] sm:$0xff] (!%p532_p9)   ;;  %v3690_v32 = vld [vmem:[%s4623_s6 + $0x90] sm:$0xff] (!%p532_p9)   ;;  %v3691_v33 = vld [vmem:[%s4623_s6 + $0x98] sm:$0xff] (!%p532_p9)   ;;  %s3232_s27 = sshll.u32 (!%p532_p9), %s3973_s0, 4  ;;  %vm2858_vm5 = vcmask (!%p532_p9), 516096  }
  0x1b   : > { %v2972_v34 = vld [vmem:[%s4624_s7 + $0x2] ss:$0 sm:$0xff] (!%p532_p9)  ;;  %v2957_v45 = vld [vmem:[%s4624_s7] ss:$0 sm:$0xff] (!%p532_p9)  ;;  %v2987_v50 = vld [vmem:[%s4624_s7 + $0x4] ss:$0 sm:$0xff] (!%p532_p9) }
  0x1c   : > { %v603_v0 = vld [vmem:[%s4655_s20] sm:$0xff] (!%p532_p9)  ;;  %3354 = vmatpush3.bf16.msra.mxu0 (!%p532_p9), %v3682_v14  ;;  %3366 = vmatpush3.bf16.msra.mxu1 (!%p532_p9), %v3683_v15  ;;  %v3693_v51 = vld [vmem:[%s4623_s6 + $0x28] sm:$0xff] (!%p532_p9)   ;;  %v3694_v56 = vld [vmem:[%s4623_s6 + $0x30] sm:$0xff] (!%p532_p9)   ;;  %s588_s20 = sand.u32 (!%p532_p9), 1, %s3844_s28  }
  0x1d   : > { %3355 = vmatprep.subr.bf16.mxu0 (!%p532_p9), %v3854_v12  ;;  %3367 = vmatprep.subr.bf16.mxu1 (!%p532_p9), %v3854_v12  ;;  %v3692_v48 = vld [vmem:[%s4623_s6 + $0x20] sm:$0xff] (!%p532_p9)   ;;  %v3695_v60 = vld [vmem:[%s4623_s6 + $0x38] sm:$0xff] (!%p532_p9)   ;;  %v3697_v62 = vld [vmem:[%s4623_s6 + $0xa8] sm:$0xff] (!%p532_p9)   ;;  %s2861_s19 = scalar_lea.sflag (!%p532_p9), [#allocation3], %s588_s20 }
  0x1e   : > { %s4002_s24 = scalar_select %p590_p10, %s3973_s0, 1  ;;  %v3696_v61 = vld [vmem:[%s4623_s6 + $0xa0] sm:$0xff]   ;;  %v3698_v63 = vld [vmem:[%s4623_s6 + $0xb0] sm:$0xff]  }
  0x1f   : > { %s3856_s0 = smov [#allocation2]  }
  0x20   : > { %s2953_s25 = sshll.u32 %s4002_s24, 3  ;;  %3356 = vmatpush3.bf16.msra.mxu0 %v3684_v16  ;;  %3368 = vmatpush3.bf16.msra.mxu1 %v3685_v17 }
  0x21   : > { %s593_s1 = scalar_lea.vmem %s4656_s29, %s2953_s25  ;;  %s597_s18 = scalar_lea.vmem %s4657_s30, %s2953_s25  ;;  %3357 = vmatprep.subr.bf16.mxu0 %v3854_v12  ;;  %3369 = vmatprep.subr.bf16.mxu1 %v3854_v12 }
  0x22   : > { %v602_v1 = vld [vmem:[%s593_s1] sm:$0xff]  ;;  %s600_s30 = scalar_lea.vmem %s4620_s3, %s4002_s24  ;;  %s4658_s25 = sld [smem:[#allocation14_spill]] }
  0x23   : > { %v605_v2 = vld [vmem:[%s597_s18] sm:$0xff]  ;;  %v604_v3 = vadd.f32 %v603_v0, %v602_v1  ;;  %v3699_v0 = vld [vmem:[%s4623_s6 + $0xb8] sm:$0xff]   ;;  %s3794_s29 = sshll.u32 %s3856_s0, 4  ;;  %s3795_s29 = int_to_ptr.vmem [resolvable:$false] %s3794_s29 }
  0x24   : > { %3358 = vmatpush3.bf16.msra.mxu0 %v3686_v18  ;;  %3370 = vmatpush3.bf16.msra.mxu1 %v3687_v19  ;;  %s3796_s22 = scalar_lea.vmem %s3795_s29, 32 }
  0x25   : > { %v606_v4 = vadd.f32 %v605_v2, %v604_v3  ;;  %3375 = vmatprep.subr.bf16.mxu0 %v3854_v12  ;;  %3393 = vmatprep.subr.bf16.mxu1 %v3854_v12  ;;  %v4154_v2 = vld [vmem:[%s600_s30] ss:$0 sm:$0xff]  ;;  %s589_s30 = scalar_lea.vmem [#allocation2], %s588_s20 }
  0x26   : > { %s2873_s24 = sshll.u32 %s589_s30, 4  ;;  %s4577_s24 = int_to_ptr.vmem [resolvable:$true] %s2873_s24 }
  0x27   : > { %v610_v5 = vsel %vm609_vm0, %v606_v4, 0.0  ;;  %s3790_s21 = scalar_lea.vmem %s4577_s24, 16  ;;  %p3797_p0 = scmp.lt.s32.totalorder %s4577_s24, %s3795_s29 }
  0x28   : > { %611 = vadd.xlane.f32.xlu0 %v610_v5  ;;  %s4575_s26 = scalar_lea.hbm %s4658_s25, %s3232_s27  ;;  %p3791_p11 = scmp.ne.s32.totalorder %s4577_s24, %s3790_s21 }
  0x29   : > { %p3798_p1 = scmp.lt.s32.totalorder %s3796_s22, %s3790_s21 }
  0x2a   : > { %p3792_p12 = pnand %p3791_p11, %p3990_p5 }
  0x2b   : > { %p3799_p2 = por %p3798_p1, %p3797_p0 }
  0x2c   : > { %p3793_p13 = pneg %p3792_p12 }
  0x2e   : > { %p3800_p3 = pnand %p3799_p2, %p3793_p13 }
  0xb5   : > { %v612_v6 = vpop.xlane.xlu0 %611 }
  0xb6   : > { %v614_v7 = vmul.f32 0.015625, %v612_v6 }
  0xb8   : > { %v615_v8 = vsub.f32 %v606_v4, %v614_v7 }
  0xba   : > { %v616_v9 = vmul.f32 %v615_v8, %v615_v8 }
  0xbc   : > { %v617_v10 = vsel %vm609_vm0, %v616_v9, 0.0 }
  0xbd   : > { %618 = vadd.xlane.f32.xlu0 %v617_v10 }
 0x14a   : > { %v619_v20 = vpop.xlane.xlu0 %618 }
 0x14b   : > { %v620_v21 = vmul.f32 0.015625, %v619_v20 }
 0x14d   : > { %v621_v22 = vadd.f32 1e-12, %v620_v21 }
 0x14f   : > { %3760 = vrsqrt.f32 %v621_v22 }
 0x159   : > { %v3761_v23 = vpop.eup %3760 }
 0x15a   : > { %v623_v25 = vmul.f32 %v3761_v23, %v615_v8 }
 0x15c   : > { %v630_v27 = vmul.f32 %v2955_v24, %v623_v25 }
 0x15e   : > { %v4060_v28 = vadd.f32 %v2956_v26, %v630_v27  ;;  %v3700_v26 = vld [vmem:[%s4623_s6 + $0x60] sm:$0xff]  }
 0x160   : > { %v4067_v30 = vpack.c.bf16 %v4060_v28, %v4060_v28 }
 0x162   : > { %3360 = vmatmul.mubr.msk.bf16.vlgmr.msra.gmra.mrb[0].mxu0 %vm609_vm0, %v4067_v30  ;;  %3372 = vmatmul.mubr.msk.bf16.vlgmr.msra.gmra.mrb[0].mxu1 %vm609_vm0, %v4067_v30 }
 0x163   : > { %3376 = vmatpush3.bf16.msra.mxu0 %v3688_v29  ;;  %3383 = vmatprep.mubr.msk.bf16.mxu0 %vm3855_vm1, %v3854_v12  ;;  %v3701_v29 = vld [vmem:[%s4623_s6 + $0x68] sm:$0xff]  }
 0x164   : > { %3377 = vmatprep.subr.bf16.mxu0 %v3854_v12  ;;  %3395 = vmatprep.mubr.msk.bf16.mxu1 %vm3855_vm1, %v3854_v12 }
 0x167   : > { %3378 = vmatpush3.bf16.msra.mxu0 %v3689_v31  ;;  %v3702_v31 = vld [vmem:[%s4623_s6 + $0x70] sm:$0xff]  }
 0x168   : > { %3379 = vmatprep.subr.bf16.mxu0 %v3854_v12 }
 0x16b   : > { %3380 = vmatpush3.bf16.msra.mxu0 %v3690_v32  ;;  %v3703_v32 = vld [vmem:[%s4623_s6 + $0x78] sm:$0xff]  }
 0x16c   : > { %3381 = vmatprep.subr.bf16.mxu0 %v3854_v12 }
 0x16f   : > { %3382 = vmatpush3.bf16.msra.mxu0 %v3691_v33 }
 0x170   : > { %3387 = vmatprep.subr.bf16.mxu0 %v3854_v12 }
 0x172   : > { %3384 = vmatmul.mubr.msk.bf16.vlgmr.msra.gmra.mrb[4].mxu0 %vm609_vm0, %v4067_v30 }
 0x173   : > { %3389 = vmatprep.mubr.msk.bf16.mxu0 %vm3855_vm1, %v3854_v12 }
 0x235   : > { %v716_v35 = vpop.f32.mrb[0].mxu0  ;;  %v797_v36 = vpop.f32.mrb[0].mxu1 }
 0x236   : > { %v798_v37 = vadd.f32 %v2972_v34, %v797_v36  ;;  %v3361_v38 = vpop.f32.mrb[1].mxu0  ;;  %v3373_v39 = vpop.f32.mrb[1].mxu1  ;;  %v717_v47 = vadd.f32 %v2957_v45, %v716_v35 }
 0x237   : > { %v719_v40 = vpop.f32.mrb[2].mxu0  ;;  %v800_v41 = vpop.f32.mrb[2].mxu1 }
 0x238   : > { %v885_v42 = vpack.c.bf16 %v798_v37, %v798_v37  ;;  %v3362_v43 = vpop.f32.mrb[3].mxu0  ;;  %v3374_v44 = vpop.f32.mrb[3].mxu1  ;;  %v884_v49 = vpack.c.bf16 %v717_v47, %v717_v47  ;;  %v3020_v37 = vld [vmem:[%s4624_s7 + $0x3] ss:$0 sm:$0xff]  ;;  %v3035_v41 = vld [vmem:[%s4624_s7 + $0x5] ss:$0 sm:$0xff] }
 0x239   : > { %v3005_v44 = vld [vmem:[%s4624_s7 + $0x1] ss:$0 sm:$0xff] }
 0x23a   : > { %v891_v46 = vsel %vm886_vm2, %v885_v42, 0 }
 0x23b   : > { %3388 = vmatpush3.bf16.xpose.msra.mxu0 %v891_v46 }
 0x23c   : > { %3399 = vmatprep.subr.bf16.mxu0 %v3854_v12 }
 0x242   : > { %3390 = vmatmul.mubr.msk.bf16.vlgmr.msra.gmra.mrb[8].mxu0 %vm886_vm2, %v884_v49 }
 0x243   : > { %3400 = vmatpush3.bf16.msra.mxu0 %v3692_v48  ;;  %3407 = vmatprep.mubr.msk.bf16.mxu0 %vm3855_vm1, %v3854_v12 }
 0x244   : > { %3401 = vmatprep.subr.bf16.mxu0 %v3854_v12 }
 0x245   : > { %v878_v52 = vpop.f32.mrb[4].mxu0 }
 0x246   : > { %v879_v53 = vadd.f32 %v2987_v50, %v878_v52  ;;  %v3385_v54 = vpop.f32.mrb[5].mxu0 }
 0x247   : > { %v881_v55 = vpop.f32.mrb[6].mxu0  ;;  %3402 = vmatpush3.bf16.msra.mxu0 %v3693_v51 }
 0x248   : > { %v954_v57 = vpack.c.bf16 %v879_v53, %v879_v53  ;;  %v3386_v58 = vpop.f32.mrb[7].mxu0  ;;  %3403 = vmatprep.subr.bf16.mxu0 %v3854_v12 }
 0x24a   : > { %v960_v59 = vsel %vm958_vm3, %v954_v57, 0 }
 0x24b   : > { %3394 = vmatpush3.bf16.msra.mxu1 %v960_v59  ;;  %3404 = vmatpush3.bf16.msra.mxu0 %v3694_v56 }
 0x24c   : > { %3405 = vmatprep.subr.bf16.mxu0 %v3854_v12  ;;  %3411 = vmatprep.subr.bf16.mxu1 %v3854_v12 }
 0x24f   : > { %3406 = vmatpush3.bf16.msra.mxu0 %v3695_v60 }
 0x250   : > { %3423 = vmatprep.subr.bf16.mxu0 %v3854_v12 }
 0x252   : > { %3408 = vmatmul.mubr.msk.bf16.vlgmr.msra.gmra.mrb[12].mxu0 %vm609_vm0, %v4067_v30 }
 0x253   : > { %3424 = vmatpush3.bf16.msra.mxu0 %v3696_v61  ;;  %3431 = vmatprep.mubr.msk.bf16.mxu0 %vm3855_vm1, %v3854_v12 }
 0x254   : > { %3425 = vmatprep.subr.bf16.mxu0 %v3854_v12 }
 0x257   : > { %3426 = vmatpush3.bf16.msra.mxu0 %v3697_v62 }
 0x258   : > { %3427 = vmatprep.subr.bf16.mxu0 %v3854_v12 }
 0x25b   : > { %3428 = vmatpush3.bf16.msra.mxu0 %v3698_v63  ;;  %v3706_v63 = vld [vmem:[%s4625_s8 + $0x10] sm:$0xff]  }
 0x25c   : > { %3429 = vmatprep.subr.bf16.mxu0 %v3854_v12 }
 0x25f   : > { %3430 = vmatpush3.bf16.msra.mxu0 %v3699_v0 }
 0x260   : > { %3447 = vmatprep.subr.bf16.mxu0 %v3854_v12 }
 0x262   : > { %3432 = vmatmul.mubr.msk.bf16.vlgmr.msra.gmra.mrb[16].mxu0 %vm609_vm0, %v4067_v30 }
 0x263   : > { %3451 = vmatprep.mubr.msk.bf16.mxu0 %vm3855_vm1, %v3854_v12  ;;  %3448 = vmatpush3.bf16.msra.mxu0 %v3706_v63 }
 0x264   : > { %3449 = vmatprep.subr.bf16.mxu0 %v3854_v12 }
 0x315   : > { %v927_v1 = vpop.f32.mrb[8].mxu0 }
 0x316   : > { %v933_v3 = vmul.f32 0.17677669, %v927_v1  ;;  %v3391_v4 = vpop.f32.mrb[9].mxu0 }
 0x317   : > { %v930_v5 = vpop.f32.mrb[10].mxu0  ;;  %v3704_v4 = vld [vmem:[%s4625_s8] sm:$0xff]  }
 0x318   : > { %v3392_v6 = vpop.f32.mrb[11].mxu0  ;;  %v940_v7 = vadd.f32 %v4154_v2, %v933_v3 }
 0x319   : > { %v3705_v6 = vld [vmem:[%s4625_s8 + $0x8] sm:$0xff]  }
 0x31a   : > { %v942_v8 = vsel %vm941_vm4, %v940_v7, -inf }
 0x31b   : > { %943 = vmax.xlane.f32.xlu1 %v942_v8  ;;  %v3707_v8 = vld [vmem:[%s4625_s8 + $0x18] sm:$0xff]  }
 0x31c   : > { %3450 = vmatpush3.bf16.msra.mxu0 %v3707_v8  ;;  %v3062_v8 = vld [vmem:[%s4632_s15] ss:$0 sm:$0xff] }
 0x31d   : > { %3463 = vmatprep.subr.bf16.mxu0 %v3854_v12 }
 0x325   : > { %v1082_v9 = vpop.f32.mrb[12].mxu0 }
 0x326   : > { %v3409_v10 = vpop.f32.mrb[13].mxu0  ;;  %v1083_v47 = vadd.f32 %v3005_v44, %v1082_v9 }
 0x327   : > { %v1085_v11 = vpop.f32.mrb[14].mxu0 }
 0x328   : > { %v3410_v13 = vpop.f32.mrb[15].mxu0  ;;  %v1250_v49 = vpack.c.bf16 %v1083_v47, %v1083_v47  ;;  %v3712_v47 = vld [vmem:[%s4631_s14] sm:$0xff]  }
 0x335   : > { %v1244_v14 = vpop.f32.mrb[16].mxu0 }
 0x336   : > { %v3433_v15 = vpop.f32.mrb[17].mxu0  ;;  %v1245_v45 = vadd.f32 %v3035_v41, %v1244_v14 }
 0x337   : > { %v1247_v16 = vpop.f32.mrb[18].mxu0 }
 0x338   : > { %v3434_v17 = vpop.f32.mrb[19].mxu0  ;;  %v1312_v48 = vpack.c.bf16 %v1245_v45, %v1245_v45 }
 0x33a   : > { %v1317_v50 = vsel %vm958_vm3, %v1312_v48, 0  ;;  %v3713_v48 = vld [vmem:[%s4631_s14 + $0x8] sm:$0xff]  }
 0x3a8   : > { %v944_v18 = vpop.xlane.xlu1 %943 }
 0x3a9   : > { %v945_v19 = vsub.f32 %v940_v7, %v944_v18 }
 0x3ab   : > { %v946_v20 = vmul.f32 1.442695, %v945_v19 }
 0x3ad   : > { %3762 = vpow2.f32 %v946_v20  ;;  %v3053_v20 = vld [vmem:[%s4626_s9] ss:$0 sm:$0xff] }
 0x3b7   : > { %v3763_v21 = vpop.eup %3762 }
 0x3b8   : > { %v948_v22 = vsel %vm941_vm4, %v3763_v21, 0.0 }
 0x3b9   : > { %949 = vadd.xlane.f32.xlu1 %v948_v22 }
 0x446   : > { %v950_v23 = vpop.xlane.xlu1 %949 }
 0x447   : > { %3764 = vrcp.f32 %v950_v23 }
 0x451   : > { %v3765_v24 = vpop.eup %3764 }
 0x452   : > { %v952_v25 = vmul.f32 %v3765_v24, %v3763_v21 }
 0x454   : > { %v953_v27 = vpack.c.bf16 %v952_v25, %v952_v25 }
 0x456   : > { %3396 = vmatmul.mubr.msk.bf16.vlgmr.msra.gmra.mrb[4].mxu1 %vm941_vm4, %v953_v27 }
 0x457   : > { %3412 = vmatpush3.bf16.msra.mxu1 %v3700_v26  ;;  %3419 = vmatprep.mubr.msk.bf16.mxu1 %vm3855_vm1, %v3854_v12 }
 0x458   : > { %3413 = vmatprep.subr.bf16.mxu1 %v3854_v12 }
 0x45b   : > { %3414 = vmatpush3.bf16.msra.mxu1 %v3701_v29 }
 0x45c   : > { %3415 = vmatprep.subr.bf16.mxu1 %v3854_v12 }
 0x45f   : > { %3416 = vmatpush3.bf16.msra.mxu1 %v3702_v31 }
 0x460   : > { %3417 = vmatprep.subr.bf16.mxu1 %v3854_v12 }
 0x463   : > { %3418 = vmatpush3.bf16.msra.mxu1 %v3703_v32 }
 0x464   : > { %3435 = vmatprep.subr.bf16.mxu1 %v3854_v12 }
 0x466   : > { %3420 = vmatmul.mubr.msk.bf16.vlgmr.msra.gmra.mrb[8].mxu1 %vm609_vm0, %v4067_v30 }
 0x467   : > { %3437 = vmatprep.mubr.msk.bf16.mxu1 %vm3855_vm1, %v3854_v12 }
 0x529   : > { %v996_v33 = vpop.f32.mrb[4].mxu1 }
 0x52a   : > { %v3397_v34 = vpop.f32.mrb[5].mxu1  ;;  %v1002_v7 = vpack.c.bf16 %v996_v33, %v996_v33 }
 0x52b   : > { %v999_v35 = vpop.f32.mrb[6].mxu1 }
 0x52c   : > { %v3398_v36 = vpop.f32.mrb[7].mxu1  ;;  %v3708_v35 = vld [vmem:[%s4629_s12] sm:$0xff]  }
 0x52d   : > { %v3710_v36 = vld [vmem:[%s4629_s12 + $0x10] sm:$0xff]  }
 0x539   : > { %v1163_v38 = vpop.f32.mrb[8].mxu1 }
 0x53a   : > { %v1164_v39 = vadd.f32 %v3020_v37, %v1163_v38  ;;  %v3421_v40 = vpop.f32.mrb[9].mxu1  ;;  %v3711_v37 = vld [vmem:[%s4629_s12 + $0x18] sm:$0xff]  }
 0x53b   : > { %v1166_v42 = vpop.f32.mrb[10].mxu1 }
 0x53c   : > { %v1251_v30 = vpack.c.bf16 %v1164_v39, %v1164_v39  ;;  %v3422_v43 = vpop.f32.mrb[11].mxu1  ;;  %v3054_v42 = vld [vmem:[%s4627_s10] ss:$0 sm:$0xff] }
 0x53d   : > { %v3055_v43 = vld [vmem:[%s4628_s11] ss:$0 sm:$0xff] }
 0x53e   : > { %v1256_v46 = vsel %vm886_vm2, %v1251_v30, 0 }
 0x53f   : > { %3436 = vmatpush3.bf16.xpose.msra.mxu1 %v1256_v46 }
 0x540   : > { %3441 = vmatprep.subr.bf16.mxu1 %v3854_v12 }
 0x546   : > { %3438 = vmatmul.mubr.msk.bf16.vlgmr.msra.gmra.mrb[12].mxu1 %vm886_vm2, %v1250_v49  ;;  %v3714_v49 = vld [vmem:[%s4631_s14 + $0x10] sm:$0xff]  }
 0x547   : > { %3442 = vmatpush3.bf16.msra.mxu1 %v1317_v50  ;;  %3443 = vmatprep.mubr.msk.bf16.mxu1 %vm3855_vm1, %v3854_v12  ;;  %v3715_v50 = vld [vmem:[%s4631_s14 + $0x18] sm:$0xff]  }
 0x548   : > { %3455 = vmatprep.subr.bf16.mxu1 %v3854_v12 }
 0x619   : > { %v1292_v51 = vpop.f32.mrb[12].mxu1 }
 0x61a   : > { %v1298_v52 = vmul.f32 0.17677669, %v1292_v51  ;;  %v3439_v53 = vpop.f32.mrb[13].mxu1  ;;  %v3716_v51 = vld [vmem:[%s4631_s14 + $0x20] sm:$0xff]  }
 0x61b   : > { %v1295_v54 = vpop.f32.mrb[14].mxu1  ;;  %v3718_v53 = vld [vmem:[%s4631_s14 + $0x30] sm:$0xff]  }
 0x61c   : > { %v3440_v55 = vpop.f32.mrb[15].mxu1  ;;  %v1299_v56 = vadd.f32 %v4154_v2, %v1298_v52  ;;  %v3717_v52 = vld [vmem:[%s4631_s14 + $0x28] sm:$0xff]   ;;  %v3719_v54 = vld [vmem:[%s4631_s14 + $0x38] sm:$0xff]  }
 0x61d   : > { %v3056_v55 = vld [vmem:[%s4630_s13] ss:$0 sm:$0xff] }
 0x61e   : > { %v1300_v57 = vsel %vm941_vm4, %v1299_v56, -inf }
 0x61f   : > { %1301 = vmax.xlane.f32.xlu0 %v1300_v57 }
 0x6ac   : > { %v1302_v58 = vpop.xlane.xlu0 %1301 }
 0x6ad   : > { %v1303_v59 = vsub.f32 %v1299_v56, %v1302_v58 }
 0x6af   : > { %v1304_v60 = vmul.f32 1.442695, %v1303_v59 }
 0x6b1   : > { %3766 = vpow2.f32 %v1304_v60 }
 0x6bb   : > { %v3767_v61 = vpop.eup %3766 }
 0x6bc   : > { %v1306_v62 = vsel %vm941_vm4, %v3767_v61, 0.0 }
 0x6bd   : > { %1307 = vadd.xlane.f32.xlu1 %v1306_v62 }
 0x74a   : > { %v1308_v0 = vpop.xlane.xlu1 %1307 }
 0x74b   : > { %3768 = vrcp.f32 %v1308_v0 }
 0x755   : > { %v3769_v1 = vpop.eup %3768 }
 0x756   : > { %v1310_v3 = vmul.f32 %v3769_v1, %v3767_v61 }
 0x758   : > { %v1311_v5 = vpack.c.bf16 %v1310_v3, %v1310_v3 }
 0x75a   : > { %3444 = vmatmul.mubr.msk.bf16.vlgmr.msra.gmra.mrb[16].mxu1 %vm941_vm4, %v1311_v5 }
 0x75b   : > { %3456 = vmatpush3.bf16.msra.mxu1 %v3704_v4  ;;  %3459 = vmatprep.mubr.msk.bf16.mxu1 %vm3855_vm1, %v3854_v12 }
 0x75c   : > { %3457 = vmatprep.subr.bf16.mxu1 %v3854_v12 }
 0x75f   : > { %3458 = vmatpush3.bf16.msra.mxu1 %v3705_v6 }
 0x760   : > { %3475 = vmatprep.subr.bf16.mxu1 %v3854_v12 }
 0x762   : > { %3460 = vmatmul.mubr.msk.bf16.vlgmr.msra.gmra.mrb[20].mxu1 %vm886_vm2, %v1002_v7 }
 0x763   : > { %3491 = vmatprep.mubr.msk.bf16.mxu1 %vm3855_vm1, %v3854_v12  ;;  %3476 = vmatpush3.bf16.msra.mxu1 %v3712_v47 }
 0x764   : > { %3477 = vmatprep.subr.bf16.mxu1 %v3854_v12 }
 0x767   : > { %3478 = vmatpush3.bf16.msra.mxu1 %v3713_v48 }
 0x768   : > { %3479 = vmatprep.subr.bf16.mxu1 %v3854_v12 }
 0x76b   : > { %3480 = vmatpush3.bf16.msra.mxu1 %v3714_v49 }
 0x76c   : > { %3481 = vmatprep.subr.bf16.mxu1 %v3854_v12 }
 0x76f   : > { %3482 = vmatpush3.bf16.msra.mxu1 %v3715_v50 }
 0x770   : > { %3483 = vmatprep.subr.bf16.mxu1 %v3854_v12 }
 0x773   : > { %3484 = vmatpush3.bf16.msra.mxu1 %v3716_v51 }
 0x774   : > { %3485 = vmatprep.subr.bf16.mxu1 %v3854_v12 }
 0x777   : > { %3486 = vmatpush3.bf16.msra.mxu1 %v3717_v52 }
 0x778   : > { %3487 = vmatprep.subr.bf16.mxu1 %v3854_v12 }
 0x77b   : > { %3488 = vmatpush3.bf16.msra.mxu1 %v3718_v53 }
 0x77c   : > { %3489 = vmatprep.subr.bf16.mxu1 %v3854_v12 }
 0x77f   : > { %3490 = vmatpush3.bf16.msra.mxu1 %v3719_v54 }
 0x780   : > { %3519 = vmatprep.subr.bf16.mxu1 %v3854_v12 }
 0x82d   : > { %v1353_v9 = vpop.f32.mrb[16].mxu1 }
 0x82e   : > { %v1359_v10 = vpack.c.bf16 %v1353_v9, %v1353_v9  ;;  %v3445_v11 = vpop.f32.mrb[17].mxu1 }
 0x82f   : > { %v1356_v13 = vpop.f32.mrb[18].mxu1 }
 0x830   : > { %v3446_v14 = vpop.f32.mrb[19].mxu1  ;;  %3452 = vmatmul.mubr.msk.bf16.vlgmr.msra.gmra.mrb[20].mxu0 %vm886_vm2, %v1359_v10 }
 0x831   : > { %3471 = vmatprep.mubr.msk.bf16.mxu0 %vm3855_vm1, %v3854_v12  ;;  %3464 = vmatpush3.bf16.msra.mxu0 %v3708_v35 }
 0x832   : > { %3465 = vmatprep.subr.bf16.mxu0 %v3854_v12 }
 0x835   : > { %v1469_v15 = vpop.f32.mrb[20].mxu1 }
 0x836   : > { %v3461_v16 = vpop.f32.mrb[21].mxu1 }
 0x837   : > { %v1472_v17 = vpop.f32.mrb[22].mxu1 }
 0x838   : > { %v3462_v18 = vpop.f32.mrb[23].mxu1 }
 0x903   : > { %v1414_v19 = vpop.f32.mrb[20].mxu0 }
 0x904   : > { %v1470_v21 = vadd.f32 %v1469_v15, %v1414_v19  ;;  %v3453_v22 = vpop.f32.mrb[21].mxu0 }
 0x905   : > { %v1417_v23 = vpop.f32.mrb[22].mxu0  ;;  %v3720_v22 = vld [vmem:[%s4623_s6 + $0xc0] sm:$0xff]  }
 0x906   : > { %v1482_v24 = vadd.f32 %v3053_v20, %v1470_v21  ;;  %v3454_v25 = vpop.f32.mrb[23].mxu0  ;;  %v3721_v23 = vld [vmem:[%s4623_s6 + $0x140] sm:$0xff]  }
 0x907   : > { %v3723_v25 = vld [vmem:[%s4623_s6 + $0x148] sm:$0xff]  }
 0x908   : > { %v1483_v26 = vadd.f32 %v1482_v24, %v4060_v28  ;;  %v3709_v28 = vld [vmem:[%s4629_s12 + $0x8] sm:$0xff]  }
 0x909   : > { %3466 = vmatpush3.bf16.msra.mxu0 %v3709_v28  ;;  %v3722_v24 = vld [vmem:[%s4623_s6 + $0xc8] sm:$0xff]   ;;  %v3071_v28 = vld [vmem:[%s4633_s16] ss:$0 sm:$0xff] }
 0x90a   : > { %v1486_v27 = vsel %vm609_vm0, %v1483_v26, 0.0  ;;  %3467 = vmatprep.subr.bf16.mxu0 %v3854_v12 }
 0x90b   : > { %1487 = vadd.xlane.f32.xlu0 %v1486_v27  ;;  %v3725_v27 = vld [vmem:[%s4623_s6 + $0x150] sm:$0xff]  }
 0x90d   : > { %3468 = vmatpush3.bf16.msra.mxu0 %v3710_v36 }
 0x90e   : > { %3469 = vmatprep.subr.bf16.mxu0 %v3854_v12 }
 0x911   : > { %3470 = vmatpush3.bf16.msra.mxu0 %v3711_v37  ;;  %v3072_v37 = vld [vmem:[%s4634_s17] ss:$0 sm:$0xff] }
 0x912   : > { %3495 = vmatprep.subr.bf16.mxu0 %v3854_v12 }
 0x998   : > { %v1488_v29 = vpop.xlane.xlu0 %1487 }
 0x999   : > { %v1489_v31 = vmul.f32 0.015625, %v1488_v29  ;;  %v3726_v29 = vld [vmem:[%s4623_s6 + $0xd8] sm:$0xff]  }
 0x99b   : > { %v1490_v32 = vsub.f32 %v1483_v26, %v1489_v31  ;;  %v3724_v26 = vld [vmem:[%s4623_s6 + $0xd0] sm:$0xff]   ;;  %v3727_v31 = vld [vmem:[%s4623_s6 + $0x158] sm:$0xff]  }
 0x99d   : > { %v1491_v33 = vmul.f32 %v1490_v32, %v1490_v32 }
 0x99f   : > { %v1492_v34 = vsel %vm609_vm0, %v1491_v33, 0.0 }
 0x9a0   : > { %1493 = vadd.xlane.f32.xlu1 %v1492_v34 }
 0xa2d   : > { %v1494_v38 = vpop.xlane.xlu1 %1493 }
 0xa2e   : > { %v1495_v39 = vmul.f32 0.015625, %v1494_v38 }
 0xa30   : > { %v1496_v40 = vadd.f32 1e-12, %v1495_v39 }
 0xa32   : > { %3770 = vrsqrt.f32 %v1496_v40  ;;  %v3728_v40 = vld [vmem:[%s4623_s6 + $0x100] sm:$0xff]  }
 0xa3c   : > { %v3771_v41 = vpop.eup %3770 }
 0xa3d   : > { %v1498_v30 = vmul.f32 %v3771_v41, %v1490_v32 }
 0xa3f   : > { %v1505_v44 = vmul.f32 %v3054_v42, %v1498_v30  ;;  %v3729_v42 = vld [vmem:[%s4623_s6 + $0x108] sm:$0xff]   ;;  %v3730_v30 = vld [vmem:[%s4623_s6 + $0x110] sm:$0xff]  }
 0xa41   : > { %v1512_v45 = vadd.f32 %v3055_v43, %v1505_v44  ;;  %v3731_v43 = vld [vmem:[%s4623_s6 + $0x118] sm:$0xff]   ;;  %v3112_v44 = vld [vmem:[%s4624_s7 + $0xa] ss:$0 sm:$0xff] }
 0xa43   : > { %v1513_v46 = vpack.c.bf16 %v1512_v45, %v1512_v45 }
 0xa45   : > { %3472 = vmatmul.mubr.msk.bf16.vlgmr.msra.gmra.mrb[24].mxu0 %vm609_vm0, %v1513_v46 }
 0xa46   : > { %3503 = vmatprep.mubr.msk.bf16.mxu0 %vm3855_vm1, %v3854_v12  ;;  %3496 = vmatpush3.bf16.msra.mxu0 %v3720_v22 }
 0xa47   : > { %3497 = vmatprep.subr.bf16.mxu0 %v3854_v12 }
 0xa4a   : > { %3498 = vmatpush3.bf16.msra.mxu0 %v3722_v24 }
 0xa4b   : > { %3499 = vmatprep.subr.bf16.mxu0 %v3854_v12 }
 0xa4e   : > { %3500 = vmatpush3.bf16.msra.mxu0 %v3724_v26 }
 0xa4f   : > { %3501 = vmatprep.subr.bf16.mxu0 %v3854_v12 }
 0xa52   : > { %3502 = vmatpush3.bf16.msra.mxu0 %v3726_v29 }
 0xa53   : > { %3507 = vmatprep.subr.bf16.mxu0 %v3854_v12 }
 0xb18   : > { %v1590_v56 = vpop.f32.mrb[24].mxu0 }
 0xb19   : > { %v1591_v57 = vadd.f32 %v3056_v55, %v1590_v56  ;;  %v3473_v58 = vpop.f32.mrb[25].mxu0  ;;  %v3097_v56 = vld [vmem:[%s4624_s7 + $0x8] ss:$0 sm:$0xff] }
 0xb1a   : > { %v1593_v59 = vpop.f32.mrb[26].mxu0 }
 0xb1b   : > { %v1596_v60 = vmul.f32 %v1591_v57, %v1591_v57  ;;  %v3474_v61 = vpop.f32.mrb[27].mxu0 }
 0xb1d   : > { %v1597_v62 = vmul.f32 %v1596_v60, %v1591_v57 }
 0xb1f   : > { %v1598_v63 = vmul.f32 0.044715, %v1597_v62 }
 0xb21   : > { %v1599_v0 = vadd.f32 %v1598_v63, %v1591_v57  ;;  %v3082_v63 = vld [vmem:[%s4624_s7 + $0x6] ss:$0 sm:$0xff] }
 0xb23   : > { %v1600_v1 = vmul.f32 0.7978846, %v1599_v0 }
 0xb25   : > { %3772 = vtanh.f32 %v1600_v1 }
 0xb2f   : > { %v3773_v3 = vpop.eup %3772 }
 0xb30   : > { %v1602_v4 = vadd.f32 1.0, %v3773_v3  ;;  %v3732_v3 = vld [vmem:[%s4623_s6 + $0xe0] sm:$0xff]  }
 0xb32   : > { %v1603_v5 = vmul.f32 0.5, %v1602_v4 }
 0xb34   : > { %v1604_v6 = vmul.f32 %v1603_v5, %v1591_v57  ;;  %v3733_v5 = vld [vmem:[%s4623_s6 + $0xe8] sm:$0xff]  }
 0xb36   : > { %v1605_v7 = vpack.c.bf16 %v1604_v6, %v1604_v6  ;;  %v3734_v6 = vld [vmem:[%s4623_s6 + $0xf0] sm:$0xff]  }
 0xb38   : > { %3492 = vmatmul.mubr.bf16.vlgmr.msra.gmra.mrb[24].mxu1 %v1605_v7  ;;  %v3735_v7 = vld [vmem:[%s4623_s6 + $0xf8] sm:$0xff]  }
 0xb39   : > { %3527 = vmatprep.mubr.msk.bf16.mxu1 %vm3855_vm1, %v3854_v12  ;;  %3520 = vmatpush3.bf16.msra.mxu1 %v3721_v23 }
 0xb3a   : > { %3521 = vmatprep.subr.bf16.mxu1 %v3854_v12 }
 0xb3d   : > { %3522 = vmatpush3.bf16.msra.mxu1 %v3723_v25 }
 0xb3e   : > { %3523 = vmatprep.subr.bf16.mxu1 %v3854_v12 }
 0xb41   : > { %3524 = vmatpush3.bf16.msra.mxu1 %v3725_v27 }
 0xb42   : > { %3525 = vmatprep.subr.bf16.mxu1 %v3854_v12 }
 0xb45   : > { %3526 = vmatpush3.bf16.msra.mxu1 %v3727_v31 }
 0xb46   : > { %3537 = vmatprep.subr.bf16.mxu1 %v3854_v12 }
 0xc0b   : > { %v1711_v9 = vpop.f32.mrb[24].mxu1 }
 0xc0c   : > { %v1712_v10 = vadd.f32 %v3062_v8, %v1711_v9  ;;  %v3493_v11 = vpop.f32.mrb[25].mxu1  ;;  %v3736_v8 = vld [vmem:[%s4623_s6 + $0x160] sm:$0xff]   ;;  %v3737_v9 = vld [vmem:[%s4623_s6 + $0x168] sm:$0xff]  }
 0xc0d   : > { %v1714_v13 = vpop.f32.mrb[26].mxu1  ;;  %v3739_v11 = vld [vmem:[%s4623_s6 + $0x178] sm:$0xff]  }
 0xc0e   : > { %v3494_v14 = vpop.f32.mrb[27].mxu1  ;;  %v1717_v15 = vadd.f32 %v1712_v10, %v1512_v45  ;;  %v3738_v10 = vld [vmem:[%s4623_s6 + $0x170] sm:$0xff]  }
 0xc10   : > { %v1720_v16 = vsel %vm609_vm0, %v1717_v15, 0.0 }
 0xc11   : > { %1721 = vadd.xlane.f32.xlu0 %v1720_v16 }
 0xc9e   : > { %v1722_v17 = vpop.xlane.xlu0 %1721 }
 0xc9f   : > { %v1723_v18 = vmul.f32 0.015625, %v1722_v17 }
 0xca1   : > { %v1724_v19 = vsub.f32 %v1717_v15, %v1723_v18 }
 0xca3   : > { %v1725_v20 = vmul.f32 %v1724_v19, %v1724_v19 }
 0xca5   : > { %v1726_v21 = vsel %vm609_vm0, %v1725_v20, 0.0 }
 0xca6   : > { %1727 = vadd.xlane.f32.xlu1 %v1726_v21 }
 0xd33   : > { %v1728_v32 = vpop.xlane.xlu1 %1727 }
 0xd34   : > { %v1729_v33 = vmul.f32 0.015625, %v1728_v32 }
 0xd36   : > { %v1730_v34 = vadd.f32 1e-12, %v1729_v33 }
 0xd38   : > { %3774 = vrsqrt.f32 %v1730_v34 }
 0xd42   : > { %v3775_v35 = vpop.eup %3774 }
 0xd43   : > { %v1732_v36 = vmul.f32 %v3775_v35, %v1724_v19 }
 0xd45   : > { %v1739_v38 = vmul.f32 %v3071_v28, %v1732_v36 }
 0xd47   : > { %v4337_v39 = vadd.f32 %v3072_v37, %v1739_v38  ;;  %v3740_v37 = vld [vmem:[%s4623_s6 + $0x120] sm:$0xff]  }
 0xd49   : > { %v4344_v41 = vpack.c.bf16 %v4337_v39, %v4337_v39 }
 0xd4b   : > { %3504 = vmatmul.mubr.msk.bf16.vlgmr.msra.gmra.mrb[28].mxu0 %vm609_vm0, %v4344_v41  ;;  %3528 = vmatmul.mubr.msk.bf16.vlgmr.msra.gmra.mrb[28].mxu1 %vm609_vm0, %v4344_v41 }
 0xd4c   : > { %3508 = vmatpush3.bf16.msra.mxu0 %v3728_v40  ;;  %3515 = vmatprep.mubr.msk.bf16.mxu0 %vm3855_vm1, %v3854_v12  ;;  %v3741_v40 = vld [vmem:[%s4623_s6 + $0x128] sm:$0xff]  }
 0xd4d   : > { %3509 = vmatprep.subr.bf16.mxu0 %v3854_v12  ;;  %3539 = vmatprep.mubr.msk.bf16.mxu1 %vm3855_vm1, %v3854_v12 }
 0xd50   : > { %3510 = vmatpush3.bf16.msra.mxu0 %v3729_v42  ;;  %v3742_v42 = vld [vmem:[%s4623_s6 + $0x130] sm:$0xff]  }
 0xd51   : > { %3511 = vmatprep.subr.bf16.mxu0 %v3854_v12 }
 0xd54   : > { %3512 = vmatpush3.bf16.msra.mxu0 %v3730_v30  ;;  %v3743_v30 = vld [vmem:[%s4623_s6 + $0x138] sm:$0xff]  }
 0xd55   : > { %3513 = vmatprep.subr.bf16.mxu0 %v3854_v12 }
 0xd58   : > { %3514 = vmatpush3.bf16.msra.mxu0 %v3731_v43 }
 0xd59   : > { %3531 = vmatprep.subr.bf16.mxu0 %v3854_v12 }
 0xd5b   : > { %3516 = vmatmul.mubr.msk.bf16.vlgmr.msra.gmra.mrb[32].mxu0 %vm609_vm0, %v4344_v41 }
 0xd5c   : > { %3533 = vmatprep.mubr.msk.bf16.mxu0 %vm3855_vm1, %v3854_v12 }
 0xe1e   : > { %v1826_v45 = vpop.f32.mrb[28].mxu0  ;;  %v1988_v46 = vpop.f32.mrb[28].mxu1 }
 0xe1f   : > { %v1989_v47 = vadd.f32 %v3112_v44, %v1988_v46  ;;  %v3505_v48 = vpop.f32.mrb[29].mxu0  ;;  %v3529_v49 = vpop.f32.mrb[29].mxu1  ;;  %v1827_v1 = vadd.f32 %v3082_v63, %v1826_v45 }
 0xe20   : > { %v1829_v50 = vpop.f32.mrb[30].mxu0  ;;  %v1991_v51 = vpop.f32.mrb[30].mxu1 }
 0xe21   : > { %v2056_v52 = vpack.c.bf16 %v1989_v47, %v1989_v47  ;;  %v3506_v53 = vpop.f32.mrb[31].mxu0  ;;  %v3530_v54 = vpop.f32.mrb[31].mxu1  ;;  %v1994_v4 = vpack.c.bf16 %v1827_v1, %v1827_v1  ;;  %v3148_v47 = vld [vmem:[%s4624_s7 + $0x9] ss:$0 sm:$0xff]  ;;  %v3163_v51 = vld [vmem:[%s4624_s7 + $0xb] ss:$0 sm:$0xff] }
 0xe22   : > { %v3133_v54 = vld [vmem:[%s4624_s7 + $0x7] ss:$0 sm:$0xff] }
 0xe23   : > { %v2061_v55 = vsel %vm958_vm3, %v2056_v52, 0 }
 0xe24   : > { %3538 = vmatpush3.bf16.msra.mxu1 %v2061_v55 }
 0xe25   : > { %3555 = vmatprep.subr.bf16.mxu1 %v3854_v12 }
 0xe2e   : > { %v1907_v57 = vpop.f32.mrb[32].mxu0 }
 0xe2f   : > { %v1908_v58 = vadd.f32 %v3097_v56, %v1907_v57  ;;  %v3517_v59 = vpop.f32.mrb[33].mxu0 }
 0xe30   : > { %v1910_v60 = vpop.f32.mrb[34].mxu0 }
 0xe31   : > { %v1995_v61 = vpack.c.bf16 %v1908_v58, %v1908_v58  ;;  %v3518_v62 = vpop.f32.mrb[35].mxu0 }
 0xe33   : > { %v2000_v0 = vsel %vm886_vm2, %v1995_v61, 0 }
 0xe34   : > { %3532 = vmatpush3.bf16.xpose.msra.mxu0 %v2000_v0 }
 0xe35   : > { %3543 = vmatprep.subr.bf16.mxu0 %v3854_v12 }
 0xe3b   : > { %3534 = vmatmul.mubr.msk.bf16.vlgmr.msra.gmra.mrb[36].mxu0 %vm886_vm2, %v1994_v4 }
 0xe3c   : > { %3544 = vmatpush3.bf16.msra.mxu0 %v3732_v3  ;;  %3551 = vmatprep.mubr.msk.bf16.mxu0 %vm3855_vm1, %v3854_v12 }
 0xe3d   : > { %3545 = vmatprep.subr.bf16.mxu0 %v3854_v12 }
 0xe40   : > { %3546 = vmatpush3.bf16.msra.mxu0 %v3733_v5 }
 0xe41   : > { %3547 = vmatprep.subr.bf16.mxu0 %v3854_v12 }
 0xe44   : > { %3548 = vmatpush3.bf16.msra.mxu0 %v3734_v6 }
 0xe45   : > { %3549 = vmatprep.subr.bf16.mxu0 %v3854_v12 }
 0xe48   : > { %3550 = vmatpush3.bf16.msra.mxu0 %v3735_v7 }
 0xe49   : > { %3567 = vmatprep.subr.bf16.mxu0 %v3854_v12 }
 0xe4b   : > { %3552 = vmatmul.mubr.msk.bf16.vlgmr.msra.gmra.mrb[40].mxu0 %vm609_vm0, %v4344_v41 }
 0xe4c   : > { %3568 = vmatpush3.bf16.msra.mxu0 %v3736_v8  ;;  %3575 = vmatprep.mubr.msk.bf16.mxu0 %vm3855_vm1, %v3854_v12 }
 0xe4d   : > { %3569 = vmatprep.subr.bf16.mxu0 %v3854_v12 }
 0xe50   : > { %3570 = vmatpush3.bf16.msra.mxu0 %v3737_v9 }
 0xe51   : > { %3571 = vmatprep.subr.bf16.mxu0 %v3854_v12 }
 0xe54   : > { %3572 = vmatpush3.bf16.msra.mxu0 %v3738_v10  ;;  %v3746_v10 = vld [vmem:[%s4625_s8 + $0x30] sm:$0xff]  }
 0xe55   : > { %3573 = vmatprep.subr.bf16.mxu0 %v3854_v12 }
 0xe58   : > { %3574 = vmatpush3.bf16.msra.mxu0 %v3739_v11 }
 0xe59   : > { %3591 = vmatprep.subr.bf16.mxu0 %v3854_v12 }
 0xe5b   : > { %3576 = vmatmul.mubr.msk.bf16.vlgmr.msra.gmra.mrb[44].mxu0 %vm609_vm0, %v4344_v41 }
 0xe5c   : > { %3595 = vmatprep.mubr.msk.bf16.mxu0 %vm3855_vm1, %v3854_v12  ;;  %3592 = vmatpush3.bf16.msra.mxu0 %v3746_v10 }
 0xe5d   : > { %3593 = vmatprep.subr.bf16.mxu0 %v3854_v12 }
 0xf0e   : > { %v2036_v13 = vpop.f32.mrb[36].mxu0 }
 0xf0f   : > { %v2042_v14 = vmul.f32 0.17677669, %v2036_v13  ;;  %v3535_v15 = vpop.f32.mrb[37].mxu0 }
 0xf10   : > { %v2039_v16 = vpop.f32.mrb[38].mxu0 }
 0xf11   : > { %v3536_v17 = vpop.f32.mrb[39].mxu0  ;;  %v2043_v18 = vadd.f32 %v4154_v2, %v2042_v14  ;;  %v3744_v14 = vld [vmem:[%s4625_s8 + $0x20] sm:$0xff]   ;;  %v3745_v16 = vld [vmem:[%s4625_s8 + $0x28] sm:$0xff]  }
 0xf13   : > { %v2044_v19 = vsel %vm941_vm4, %v2043_v18, -inf }
 0xf14   : > { %2045 = vmax.xlane.f32.xlu0 %v2044_v19 }
 0xf1e   : > { %v2184_v20 = vpop.f32.mrb[40].mxu0 }
 0xf1f   : > { %v3553_v21 = vpop.f32.mrb[41].mxu0  ;;  %v2185_v57 = vadd.f32 %v3133_v54, %v2184_v20 }
 0xf20   : > { %v2187_v22 = vpop.f32.mrb[42].mxu0 }
 0xf21   : > { %v3554_v23 = vpop.f32.mrb[43].mxu0  ;;  %v2352_v59 = vpack.c.bf16 %v2185_v57, %v2185_v57  ;;  %v3753_v57 = vld [vmem:[%s4631_s14 + $0x48] sm:$0xff]  }
 0xf2e   : > { %v2346_v24 = vpop.f32.mrb[44].mxu0 }
 0xf2f   : > { %v3577_v25 = vpop.f32.mrb[45].mxu0  ;;  %v2347_v55 = vadd.f32 %v3163_v51, %v2346_v24  ;;  %v3185_v51 = vld [vmem:[%s4627_s10 + $0x1] ss:$0 sm:$0xff] }
 0xf30   : > { %v2349_v26 = vpop.f32.mrb[46].mxu0 }
 0xf31   : > { %v3578_v27 = vpop.f32.mrb[47].mxu0  ;;  %v2414_v58 = vpack.c.bf16 %v2347_v55, %v2347_v55 }
 0xf33   : > { %v2419_v60 = vsel %vm958_vm3, %v2414_v58, 0  ;;  %v3754_v58 = vld [vmem:[%s4631_s14 + $0x50] sm:$0xff]  }
 0xfa1   : > { %v2046_v29 = vpop.xlane.xlu0 %2045 }
 0xfa2   : > { %v2047_v31 = vsub.f32 %v2043_v18, %v2046_v29  ;;  %v3747_v18 = vld [vmem:[%s4625_s8 + $0x38] sm:$0xff]  }
 0xfa3   : > { %3594 = vmatpush3.bf16.msra.mxu0 %v3747_v18 }
 0xfa4   : > { %v2048_v32 = vmul.f32 1.442695, %v2047_v31  ;;  %3607 = vmatprep.subr.bf16.mxu0 %v3854_v12  ;;  %v3182_v31 = vld [vmem:[%s4626_s9 + $0x1] ss:$0 sm:$0xff] }
 0xfa6   : > { %3776 = vpow2.f32 %v2048_v32 }
 0xfb0   : > { %v3777_v33 = vpop.eup %3776 }
 0xfb1   : > { %v2050_v34 = vsel %vm941_vm4, %v3777_v33, 0.0 }
 0xfb2   : > { %2051 = vadd.xlane.f32.xlu1 %v2050_v34 }
0x103f   : > { %v2052_v35 = vpop.xlane.xlu1 %2051 }
0x1040   : > { %3778 = vrcp.f32 %v2052_v35 }
0x104a   : > { %v3779_v28 = vpop.eup %3778 }
0x104b   : > { %v2054_v36 = vmul.f32 %v3779_v28, %v3777_v33 }
0x104d   : > { %v2055_v38 = vpack.c.bf16 %v2054_v36, %v2054_v36 }
0x104f   : > { %3540 = vmatmul.mubr.msk.bf16.vlgmr.msra.gmra.mrb[32].mxu1 %vm941_vm4, %v2055_v38 }
0x1050   : > { %3556 = vmatpush3.bf16.msra.mxu1 %v3740_v37  ;;  %3563 = vmatprep.mubr.msk.bf16.mxu1 %vm3855_vm1, %v3854_v12 }
0x1051   : > { %3557 = vmatprep.subr.bf16.mxu1 %v3854_v12 }
0x1054   : > { %3558 = vmatpush3.bf16.msra.mxu1 %v3741_v40 }
0x1055   : > { %3559 = vmatprep.subr.bf16.mxu1 %v3854_v12 }
0x1058   : > { %3560 = vmatpush3.bf16.msra.mxu1 %v3742_v42 }
0x1059   : > { %3561 = vmatprep.subr.bf16.mxu1 %v3854_v12 }
0x105c   : > { %3562 = vmatpush3.bf16.msra.mxu1 %v3743_v30 }
0x105d   : > { %3579 = vmatprep.subr.bf16.mxu1 %v3854_v12 }
0x105f   : > { %3564 = vmatmul.mubr.msk.bf16.vlgmr.msra.gmra.mrb[36].mxu1 %vm609_vm0, %v4344_v41 }
0x1060   : > { %3581 = vmatprep.mubr.msk.bf16.mxu1 %vm3855_vm1, %v3854_v12 }
0x1122   : > { %v2097_v43 = vpop.f32.mrb[32].mxu1 }
0x1123   : > { %v3541_v44 = vpop.f32.mrb[33].mxu1  ;;  %v2103_v17 = vpack.c.bf16 %v2097_v43, %v2097_v43 }
0x1124   : > { %v2100_v45 = vpop.f32.mrb[34].mxu1  ;;  %v3748_v44 = vld [vmem:[%s4629_s12 + $0x20] sm:$0xff]  }
0x1125   : > { %v3542_v46 = vpop.f32.mrb[35].mxu1  ;;  %v3750_v45 = vld [vmem:[%s4629_s12 + $0x30] sm:$0xff]  }
0x1126   : > { %v3751_v46 = vld [vmem:[%s4629_s12 + $0x38] sm:$0xff]  }
0x1132   : > { %v2265_v48 = vpop.f32.mrb[36].mxu1 }
0x1133   : > { %v2266_v49 = vadd.f32 %v3148_v47, %v2265_v48  ;;  %v3565_v50 = vpop.f32.mrb[37].mxu1 }
0x1134   : > { %v2268_v52 = vpop.f32.mrb[38].mxu1 }
0x1135   : > { %v2353_v41 = vpack.c.bf16 %v2266_v49, %v2266_v49  ;;  %v3566_v53 = vpop.f32.mrb[39].mxu1 }
0x1137   : > { %v2358_v56 = vsel %vm886_vm2, %v2353_v41, 0  ;;  %v3186_v41 = vld [vmem:[%s4628_s11 + $0x1] ss:$0 sm:$0xff] }
0x1138   : > { %3580 = vmatpush3.bf16.xpose.msra.mxu1 %v2358_v56  ;;  %v3752_v56 = vld [vmem:[%s4631_s14 + $0x40] sm:$0xff]  }
0x1139   : > { %3585 = vmatprep.subr.bf16.mxu1 %v3854_v12 }
0x113f   : > { %3582 = vmatmul.mubr.msk.bf16.vlgmr.msra.gmra.mrb[40].mxu1 %vm886_vm2, %v2352_v59  ;;  %v3755_v59 = vld [vmem:[%s4631_s14 + $0x58] sm:$0xff]  }
0x1140   : > { %3586 = vmatpush3.bf16.msra.mxu1 %v2419_v60  ;;  %3587 = vmatprep.mubr.msk.bf16.mxu1 %vm3855_vm1, %v3854_v12  ;;  %v3756_v60 = vld [vmem:[%s4631_s14 + $0x60] sm:$0xff]  }
0x1141   : > { %3599 = vmatprep.subr.bf16.mxu1 %v3854_v12 }
0x1212   : > { %v2394_v61 = vpop.f32.mrb[40].mxu1 }
0x1213   : > { %v2400_v62 = vmul.f32 0.17677669, %v2394_v61  ;;  %v3583_v63 = vpop.f32.mrb[41].mxu1  ;;  %v3757_v61 = vld [vmem:[%s4631_s14 + $0x68] sm:$0xff]  }
0x1214   : > { %v2397_v0 = vpop.f32.mrb[42].mxu1  ;;  %v3759_v63 = vld [vmem:[%s4631_s14 + $0x78] sm:$0xff]  }
0x1215   : > { %v3584_v1 = vpop.f32.mrb[43].mxu1  ;;  %v2401_v3 = vadd.f32 %v4154_v2, %v2400_v62  ;;  %v3758_v62 = vld [vmem:[%s4631_s14 + $0x70] sm:$0xff]   ;;  %v3196_v0 = vld [vmem:[%s4630_s13 + $0x1] ss:$0 sm:$0xff] }
0x1217   : > { %v2402_v4 = vsel %vm941_vm4, %v2401_v3, -inf }
0x1218   : > { %2403 = vmax.xlane.f32.xlu0 %v2402_v4 }
0x12a5   : > { %v2404_v5 = vpop.xlane.xlu0 %2403 }
0x12a6   : > { %v2405_v6 = vsub.f32 %v2401_v3, %v2404_v5 }
0x12a8   : > { %v2406_v7 = vmul.f32 1.442695, %v2405_v6 }
0x12aa   : > { %3780 = vpow2.f32 %v2406_v7 }
0x12b4   : > { %v3781_v8 = vpop.eup %3780 }
0x12b5   : > { %v2408_v9 = vsel %vm941_vm4, %v3781_v8, 0.0 }
0x12b6   : > { %2409 = vadd.xlane.f32.xlu1 %v2408_v9 }
0x1343   : > { %v2410_v11 = vpop.xlane.xlu1 %2409 }
0x1344   : > { %3782 = vrcp.f32 %v2410_v11 }
0x134e   : > { %v3783_v2 = vpop.eup %3782 }
0x134f   : > { %v2412_v13 = vmul.f32 %v3783_v2, %v3781_v8 }
0x1351   : > { %v2413_v15 = vpack.c.bf16 %v2412_v13, %v2412_v13 }
0x1353   : > { %3588 = vmatmul.mubr.msk.bf16.vlgmr.msra.gmra.mrb[44].mxu1 %vm941_vm4, %v2413_v15 }
0x1354   : > { %3600 = vmatpush3.bf16.msra.mxu1 %v3744_v14  ;;  %3603 = vmatprep.mubr.msk.bf16.mxu1 %vm3855_vm1, %v3854_v12 }
0x1355   : > { %3601 = vmatprep.subr.bf16.mxu1 %v3854_v12 }
0x1358   : > { %3602 = vmatpush3.bf16.msra.mxu1 %v3745_v16  ;;  %v3219_v16 = vld [vmem:[%s4632_s15 + $0x1] ss:$0 sm:$0xff] }
0x1359   : > { %3619 = vmatprep.subr.bf16.mxu1 %v3854_v12 }
0x135b   : > { %3604 = vmatmul.mubr.msk.bf16.vlgmr.msra.gmra.mrb[48].mxu1 %vm886_vm2, %v2103_v17 }
0x135c   : > { %3635 = vmatprep.mubr.msk.bf16.mxu1 %vm3855_vm1, %v3854_v12  ;;  %3620 = vmatpush3.bf16.msra.mxu1 %v3752_v56 }
0x135d   : > { %3621 = vmatprep.subr.bf16.mxu1 %v3854_v12 }
0x1360   : > { %3622 = vmatpush3.bf16.msra.mxu1 %v3753_v57 }
0x1361   : > { %3623 = vmatprep.subr.bf16.mxu1 %v3854_v12 }
0x1364   : > { %3624 = vmatpush3.bf16.msra.mxu1 %v3754_v58 }
0x1365   : > { %3625 = vmatprep.subr.bf16.mxu1 %v3854_v12 }
0x1368   : > { %3626 = vmatpush3.bf16.msra.mxu1 %v3755_v59 }
0x1369   : > { %3627 = vmatprep.subr.bf16.mxu1 %v3854_v12 }
0x136c   : > { %3628 = vmatpush3.bf16.msra.mxu1 %v3756_v60 }
0x136d   : > { %3629 = vmatprep.subr.bf16.mxu1 %v3854_v12 }
0x1370   : > { %3630 = vmatpush3.bf16.msra.mxu1 %v3757_v61 }
0x1371   : > { %3631 = vmatprep.subr.bf16.mxu1 %v3854_v12 }
0x1374   : > { %3632 = vmatpush3.bf16.msra.mxu1 %v3758_v62 }
0x1375   : > { %3633 = vmatprep.subr.bf16.mxu1 %v3854_v12 }
0x1378   : > { %3634 = vmatpush3.bf16.msra.mxu1 %v3759_v63 }
0x1426   : > { %v2455_v19 = vpop.f32.mrb[44].mxu1 }
0x1427   : > { %v2461_v20 = vpack.c.bf16 %v2455_v19, %v2455_v19  ;;  %v3589_v21 = vpop.f32.mrb[45].mxu1 }
0x1428   : > { %v2458_v22 = vpop.f32.mrb[46].mxu1 }
0x1429   : > { %v3590_v23 = vpop.f32.mrb[47].mxu1  ;;  %3596 = vmatmul.mubr.msk.bf16.vlgmr.msra.gmra.mrb[48].mxu0 %vm886_vm2, %v2461_v20 }
0x142a   : > { %3615 = vmatprep.mubr.msk.bf16.mxu0 %vm3855_vm1, %v3854_v12  ;;  %3608 = vmatpush3.bf16.msra.mxu0 %v3748_v44 }
0x142b   : > { %3609 = vmatprep.subr.bf16.mxu0 %v3854_v12 }
0x142e   : > { %v2571_v24 = vpop.f32.mrb[48].mxu1 }
0x142f   : > { %v3605_v25 = vpop.f32.mrb[49].mxu1 }
0x1430   : > { %v2574_v26 = vpop.f32.mrb[50].mxu1 }
0x1431   : > { %v3606_v27 = vpop.f32.mrb[51].mxu1 }
0x14fc   : > { %v2516_v29 = vpop.f32.mrb[48].mxu0 }
0x14fd   : > { %v2572_v32 = vadd.f32 %v2571_v24, %v2516_v29  ;;  %v3597_v33 = vpop.f32.mrb[49].mxu0 }
0x14fe   : > { %v2519_v34 = vpop.f32.mrb[50].mxu0 }
0x14ff   : > { %v2585_v35 = vadd.f32 %v3182_v31, %v2572_v32  ;;  %v3598_v28 = vpop.f32.mrb[51].mxu0 }
0x1501   : > { %v2586_v36 = vadd.f32 %v2585_v35, %v4337_v39  ;;  %v3749_v39 = vld [vmem:[%s4629_s12 + $0x28] sm:$0xff]   ;;  %v3230_v35 = vld [vmem:[%s4633_s16 + $0x1] ss:$0 sm:$0xff] }
0x1502   : > { %3610 = vmatpush3.bf16.msra.mxu0 %v3749_v39 }
0x1503   : > { %v2591_v37 = vsel %vm609_vm0, %v2586_v36, 0.0  ;;  %3611 = vmatprep.subr.bf16.mxu0 %v3854_v12 }
0x1504   : > { %2592 = vadd.xlane.f32.xlu0 %v2591_v37 }
0x1506   : > { %3612 = vmatpush3.bf16.msra.mxu0 %v3750_v45 }
0x1507   : > { %3613 = vmatprep.subr.bf16.mxu0 %v3854_v12 }
0x150a   : > { %3614 = vmatpush3.bf16.msra.mxu0 %v3751_v46 }
0x1591   : > { %v2593_v38 = vpop.xlane.xlu0 %2592 }
0x1592   : > { %v2594_v40 = vmul.f32 0.015625, %v2593_v38 }
0x1594   : > { %v2595_v42 = vsub.f32 %v2586_v36, %v2594_v40  ;;  %v3231_v36 = vld [vmem:[%s4634_s17 + $0x1] ss:$0 sm:$0xff] }
0x1596   : > { %v2596_v30 = vmul.f32 %v2595_v42, %v2595_v42 }
0x1598   : > { %v2597_v43 = vsel %vm609_vm0, %v2596_v30, 0.0 }
0x1599   : > { %2598 = vadd.xlane.f32.xlu1 %v2597_v43 }
0x1626   : > { %v2599_v47 = vpop.xlane.xlu1 %2598 }
0x1627   : > { %v2600_v48 = vmul.f32 0.015625, %v2599_v47 }
0x1629   : > { %v2601_v49 = vadd.f32 1e-12, %v2600_v48 }
0x162b   : > { %3784 = vrsqrt.f32 %v2601_v49 }
0x1635   : > { %v3785_v50 = vpop.eup %3784 }
0x1636   : > { %v2603_v52 = vmul.f32 %v3785_v50, %v2595_v42 }
0x1638   : > { %v2610_v53 = vmul.f32 %v3185_v51, %v2603_v52 }
0x163a   : > { %v2617_v54 = vadd.f32 %v3186_v41, %v2610_v53 }
0x163c   : > { %v2618_v55 = vpack.c.bf16 %v2617_v54, %v2617_v54 }
0x163e   : > { %3616 = vmatmul.mubr.msk.bf16.vlgmr.msra.gmra.mrb[52].mxu0 %vm609_vm0, %v2618_v55 }
0x1711   : > { %v2697_v1 = vpop.f32.mrb[52].mxu0 }
0x1712   : > { %v2698_v3 = vadd.f32 %v3196_v0, %v2697_v1  ;;  %v3617_v4 = vpop.f32.mrb[53].mxu0 }
0x1713   : > { %v2700_v5 = vpop.f32.mrb[54].mxu0 }
0x1714   : > { %v2703_v6 = vmul.f32 %v2698_v3, %v2698_v3  ;;  %v3618_v7 = vpop.f32.mrb[55].mxu0 }
0x1716   : > { %v2704_v8 = vmul.f32 %v2703_v6, %v2698_v3 }
0x1718   : > { %v2705_v9 = vmul.f32 0.044715, %v2704_v8 }
0x171a   : > { %v2706_v10 = vadd.f32 %v2705_v9, %v2698_v3 }
0x171c   : > { %v2707_v11 = vmul.f32 0.7978846, %v2706_v10 }
0x171e   : > { %3786 = vtanh.f32 %v2707_v11 }
0x1728   : > { %v3787_v2 = vpop.eup %3786 }
0x1729   : > { %v2709_v13 = vadd.f32 1.0, %v3787_v2 }
0x172b   : > { %v2710_v14 = vmul.f32 0.5, %v2709_v13 }
0x172d   : > { %v2711_v12 = vmul.f32 %v2710_v14, %v2698_v3 }
0x172f   : > { %v2712_v15 = vpack.c.bf16 %v2711_v12, %v2711_v12 }
0x1731   : > { %3636 = vmatmul.mubr.bf16.vlgmr.msra.gmra.mrb[52].mxu1 %v2712_v15 }
0x1804   : > { %v2820_v17 = vpop.f32.mrb[52].mxu1 }
0x1805   : > { %v2821_v18 = vadd.f32 %v3219_v16, %v2820_v17  ;;  %v3637_v19 = vpop.f32.mrb[53].mxu1 }
0x1806   : > { %v2823_v20 = vpop.f32.mrb[54].mxu1 }
0x1807   : > { %v3638_v21 = vpop.f32.mrb[55].mxu1  ;;  %v2826_v22 = vadd.f32 %v2821_v18, %v2617_v54 }
0x1809   : > { %v2831_v23 = vsel %vm609_vm0, %v2826_v22, 0.0 }
0x180a   : > { %2832 = vadd.xlane.f32.xlu0 %v2831_v23 }
0x1897   : > { %v2833_v24 = vpop.xlane.xlu0 %2832 }
0x1898   : > { %v2834_v25 = vmul.f32 0.015625, %v2833_v24 }
0x189a   : > { %v2835_v26 = vsub.f32 %v2826_v22, %v2834_v25 }
0x189c   : > { %v2836_v27 = vmul.f32 %v2835_v26, %v2835_v26 }
0x189e   : > { %v2837_v29 = vsel %vm609_vm0, %v2836_v27, 0.0 }
0x189f   : > { %2838 = vadd.xlane.f32.xlu1 %v2837_v29 }
0x192c   : > { %v2839_v31 = vpop.xlane.xlu1 %2838 }
0x192d   : > { %v2840_v32 = vmul.f32 0.015625, %v2839_v31 }
0x192f   : > { %v2841_v33 = vadd.f32 1e-12, %v2840_v32 }
0x1931   : > { %3788 = vrsqrt.f32 %v2841_v33 }
0x193b   : > { %v3789_v34 = vpop.eup %3788 }
0x193c   : > { %v2843_v28 = vmul.f32 %v3789_v34, %v2835_v26 }
0x193e   : > { %v2850_v37 = vmul.f32 %v3230_v35, %v2843_v28 }
0x1940   : > { %v2857_v38 = vadd.f32 %v3231_v36, %v2850_v37 }
0x1942   : > { %2859 = vst.msk [vmem:[%s589_s30] sm:$0x1] %vm2858_vm5, %v2857_v38 }
0x1943   : > { %3803 = shalt.err (!%p3800_p3)
}
0x1944   : > { %s3804_s20 = scalar_lea.hbm %s4575_s26, 16  ;;  %s3808_s30 = scalar_lea.hbm %s4658_s25, 32 }
0x1945   : > { %p3805_p4 = scmp.ne.s32.totalorder %s4575_s26, %s3804_s20  ;;  %p3809_p9 = scmp.lt.u32.totalorder %s4575_s26, %s4658_s25 }
0x1946   : > { %p3810_p10 = scmp.lt.u32.totalorder %s3808_s30, %s3804_s20  ;;  %p3812_p12 = scmp.lt.u32.totalorder %s3804_s20, %s4575_s26 }
0x1947   : > { %p3806_p7 = pnand %p3805_p4, %p3990_p5 }
0x1948   : > { %p3811_p11 = por %p3810_p10, %p3809_p9 }
0x1949   : > { %p3807_p8 = pneg %p3806_p7 }
0x194a   : > { %p3813_p13 = por %p3812_p12, %p3811_p11 }
0x194c   : > { %p3814_p0 = pnand %p3813_p13, %p3807_p8 }
0x194e   : > { %3817 = shalt.err (!%p3814_p0)
}
0x194f   : > { %3639 = dma.vmem_to_hbm [thread:$0]  (%p3990_p5), %s4577_s24, 16, %s4575_s26, %s2861_s19  }
0x1950 PF: > { %s4659_s21 = sld [smem:[#allocation7_spill]]  ;;  %s4660_s0 = sld [smem:[#allocation5_spill]] }
0x1956   : > { %p3645_p1 = scmp.ge.s32.totalorder %s4659_s21, 2  ;;  %s2885_s22 = sand.u32 1, %s4660_s0  }
0x1957   : > { %s2886_s18 = scalar_lea.sflag [#allocation3], %s2885_s22 }
0x1958   : > { %p3642_p2 = pnand %p3645_p1, %p3994_p6 }
0x195a   : > { %3835 = dma.done.wait (!%p3642_p2), %s2886_s18, 16  }
0x195b   : > { %3837 = vsyncadd (!%p3642_p2), %s2886_s18, 4294967280  ;;  %s4662_s30 = sld [smem:[#allocation8_spill]]  ;;  %s4663_s20 = sld [smem:[#allocation6_spill]] }
0x195c   : > { %s4664_s29 = sld [smem:[#allocation9_spill]]  ;;  %s4665_s27 = smov %s3844_s28 }
0x1961   : > { %p28_p3 = scmp.ge.s32.totalorder %s4662_s30, 4   ;;  %s4666_s28 = smov %s4663_s20 }
0x1963   :  { %30 = sbr.rel (!%p28_p3) target bundleno = 8 (0x8), region = 167 }
0x196a   :  { %2890 = vsyncpa [#allocation3], 1 }
0x196b   :  { %2892 = vsyncpa [#allocation3 + $0x1], 1 }

</bundles_post_ra>
